<compile_context>
chip_gen: v7x
topology: tpu7x:2x2x1
jax: 0.10.0
libtpu: 0.0.40
codegen_flags: <defaults>
</compile_context>

<pallas_src>
import jax
import jax.numpy as jnp
from jax import lax
from jax.experimental import pallas as pl
from jax.experimental.pallas import tpu as pltpu


# --------------------------------------------------------------------------- #
# Fused kernel: embedding gather + LSTM recurrence + 3-head MLP.
# --------------------------------------------------------------------------- #
def _make_action_lstm_kernel(num_layers, T, B, H):
    def kernel(tok_ref, emb_ref, *refs):
        # refs layout:
        #   [w_ih, w_hh, bias] * num_layers, w1_cat, b1_cat, w2_blk, b2_cat,
        #   y_ref, proj_sc[, hseq_sc]
        n_lstm = 3 * num_layers
        lstm_refs = refs[:n_lstm]
        w1c_ref, b1c_ref, w2c_ref, b2c_ref = refs[n_lstm:n_lstm + 4]
        y_ref = refs[n_lstm + 4]
        proj_sc = refs[n_lstm + 5]
        hseq_sc = refs[n_lstm + 6] if num_layers > 1 else None

        wih0_ref, whh0_ref, b0_ref = lstm_refs[0:3]

        # Hoisted input projection fused with the embedding lookup: project the
        # entire embedding table once and fold in the bias.  The per-token
        # input contribution is then a lane-dense (1, 4H) row gather.
        proj_sc[...] = (
            jnp.dot(emb_ref[...], wih0_ref[...],
                    preferred_element_type=jnp.float32)
            + b0_ref[...])

        def gates_to_hc(gates, c_prev):
            # PyTorch nn.LSTM gate order: [i, f, g, o].
            # Note: gate slices are H(=32)-lane; padding H to 128 would make
            # them lane-aligned, but at this size VPU/MXU are idle so the
            # structural wins dominate.
            i_g = jax.nn.sigmoid(gates[:, 0 * H:1 * H])
            f_g = jax.nn.sigmoid(gates[:, 1 * H:2 * H])
            g_g = jnp.tanh(gates[:, 2 * H:3 * H])
            o_g = jax.nn.sigmoid(gates[:, 3 * H:4 * H])
            c_new = f_g * c_prev + i_g * g_g
            h_new = o_g * jnp.tanh(c_new)
            return h_new, c_new

        zeros = jnp.zeros((B, H), jnp.float32)

        # ---- layer 0: recurrence over the gathered projected inputs ---------
        def step0(t, carry):
            h, c = carry
            rows = [proj_sc[pl.ds(tok_ref[b, t], 1), :] for b in range(B)]
            x_proj = jnp.concatenate(rows, axis=0)            # (B, 4H)
            gates = x_proj + jnp.dot(
                h, whh0_ref[...], preferred_element_type=jnp.float32)
            h, c = gates_to_hc(gates, c)
            if num_layers > 1:
                hseq_sc[t] = h
            return h, c

        h, c = lax.fori_loop(0, T, step0, (zeros, zeros), unroll=True)

        # ---- layers 1..L-1 (hidden sequence kept in VMEM scratch) -----------
        # TODO(synk): nn.LSTM inter-layer dropout (training-only) is omitted;
        # for num_layers == 1 PyTorch sets dropout = 0.0 anyway.
        for l in range(1, num_layers):
            wih_ref, whh_ref, b_ref = lstm_refs[3 * l:3 * l + 3]
            is_last = (l == num_layers - 1)

            def step_l(t, carry, wih_ref=wih_ref, whh_ref=whh_ref,
                       b_ref=b_ref, is_last=is_last):
                h, c = carry
                x_t = hseq_sc[t]                              # (B, H) prev layer
                gates = (
                    jnp.dot(x_t, wih_ref[...],
                            preferred_element_type=jnp.float32)
                    + jnp.dot(h, whh_ref[...],
                              preferred_element_type=jnp.float32)
                    + b_ref[...])
                h, c = gates_to_hc(gates, c)
                if not is_last:
                    hseq_sc[t] = h
                return h, c

            h, c = lax.fori_loop(0, T, step_l, (zeros, zeros), unroll=True)

        # ---- fused three-head MLP on the final hidden state ------------------
        # y = ReLU(h @ W1_cat + b1_cat) @ W2_blockdiag + b2_cat, lane-padded
        # to 128 so the single HBM store is unmasked.
        z = jnp.maximum(
            jnp.dot(h, w1c_ref[...], preferred_element_type=jnp.float32)
            + b1c_ref[...], 0.0)
        y = (jnp.dot(z, w2c_ref[...], preferred_element_type=jnp.float32)
             + b2c_ref[...])
        y_ref[...] = y.astype(y_ref.dtype)

    return kernel


# --------------------------------------------------------------------------- #
# Full ActionLSTM forward
# --------------------------------------------------------------------------- #
def action_lstm_forward(token_ids, params):
    token_ids = token_ids.astype(jnp.int32)
    B, T = token_ids.shape
    emb = params["embedding"]
    V, E = emb.shape
    lstm_layers = params["lstm"]
    num_layers = len(lstm_layers)
    H = lstm_layers[0]["w_hh"].shape[0]

    # ---- pack the three heads (trace-time glue, negligible cost) ------------
    head_params = params["heads"]
    head_sizes = [w2.shape[1] for (_, _, w2, _) in head_params]
    n_heads = len(head_params)
    v_tot = sum(head_sizes)
    v_pad = pl.cdiv(v_tot, 128) * 128          # lane-dense packed output
    k_pad = pl.cdiv(n_heads * H, 128) * 128    # lane-dense hidden of the heads

    w1c = jnp.zeros((H, k_pad), jnp.float32)
    b1c = jnp.zeros((1, k_pad), jnp.float32)
    w2c = jnp.zeros((k_pad, v_pad), jnp.float32)
    b2c = jnp.zeros((1, v_pad), jnp.float32)
    off_v = 0
    for k, (w1, b1, w2, b2) in enumerate(head_params):
        vk = w2.shape[1]
        w1c = w1c.at[:, k * H:(k + 1) * H].set(w1)
        b1c = b1c.at[:, k * H:(k + 1) * H].set(b1)
        w2c = w2c.at[k * H:(k + 1) * H, off_v:off_v + vk].set(w2)
        b2c = b2c.at[:, off_v:off_v + vk].set(b2)
        off_v += vk

    # ---- build inputs & specs (everything VMEM-resident, single grid step) --
    const2d = lambda i, tok: (0, 0)
    inputs = [emb]
    in_specs = [pl.BlockSpec((V, E), const2d)]
    for layer in lstm_layers:
        w_ih, w_hh, bias = layer["w_ih"], layer["w_hh"], layer["bias"]
        in_dim = w_ih.shape[0]
        inputs += [w_ih, w_hh, bias]
        in_specs += [
            pl.BlockSpec((in_dim, 4 * H), const2d),
            pl.BlockSpec((H, 4 * H), const2d),
            pl.BlockSpec((1, 4 * H), const2d),
        ]
    inputs += [w1c, b1c, w2c, b2c]
    in_specs += [
        pl.BlockSpec((H, k_pad), const2d),
        pl.BlockSpec((1, k_pad), const2d),
        pl.BlockSpec((k_pad, v_pad), const2d),
        pl.BlockSpec((1, v_pad), const2d),
    ]

    scratch_shapes = [pltpu.VMEM((V, 4 * H), jnp.float32)]   # projected emb table
    if num_layers > 1:
        scratch_shapes.append(pltpu.VMEM((T, B, H), jnp.float32))

    kernel = _make_action_lstm_kernel(num_layers, T, B, H)

    y_packed = pl.pallas_call(
        kernel,
        out_shape=jax.ShapeDtypeStruct((B, v_pad), jnp.float32),
        grid_spec=pltpu.PrefetchScalarGridSpec(
            num_scalar_prefetch=1,            # token ids -> SMEM
            grid=(1,),                        # single invocation; time loop in-kernel
            in_specs=in_specs,
            out_specs=pl.BlockSpec((B, v_pad), const2d),
            scratch_shapes=scratch_shapes,
        ),
        compiler_params=pltpu.CompilerParams(
            dimension_semantics=("arbitrary",)),
    )(token_ids, *inputs)

    outs = []
    off = 0
    for vk in head_sizes:
        outs.append(y_packed[:, off:off + vk])
        off += vk
    return tuple(outs)


# --------------------------------------------------------------------------- #
# Pure-JAX reference (for validation)
# --------------------------------------------------------------------------- #
def reference_forward(token_ids, params):
    emb = jnp.take(params["embedding"], token_ids, axis=0)     # (B, T, E)
    B, T, _ = emb.shape
    x = emb
    for layer in params["lstm"]:
        H = layer["w_hh"].shape[0]
        h = jnp.zeros((B, H), jnp.float32)
        c = jnp.zeros((B, H), jnp.float32)
        outs = []
        for t in range(T):
            gates = x[:, t, :] @ layer["w_ih"] + h @ layer["w_hh"] + layer["bias"]
            i_g = jax.nn.sigmoid(gates[:, 0 * H:1 * H])
            f_g = jax.nn.sigmoid(gates[:, 1 * H:2 * H])
            g_g = jnp.tanh(gates[:, 2 * H:3 * H])
            o_g = jax.nn.sigmoid(gates[:, 3 * H:4 * H])
            c = f_g * c + i_g * g_g
            h = o_g * jnp.tanh(c)
            outs.append(h)
        x = jnp.stack(outs, axis=1)
    last_h = x[:, -1, :]
    ys = []
    for (w1, b1, w2, b2) in params["heads"]:
        z = jnp.maximum(last_h @ w1 + b1, 0.0)
        ys.append(z @ w2 + b2)
    return tuple(ys)


# --------------------------------------------------------------------------- #
# Deterministic parameter init (synthetic, matches module __init__ shapes)
# --------------------------------------------------------------------------- #
def init_params(key, vocab_size, embed_size, hidden_dim, num_layers, name_vocab_size):
    ks = jax.random.split(key, 4 + num_layers)
    params = {}
    params["embedding"] = 0.1 * jax.random.normal(
        ks[0], (vocab_size, embed_size), jnp.float32)

    lstm_layers = []
    in_dim = embed_size
    for l in range(num_layers):
        k1, k2, k3 = jax.random.split(ks[1 + l], 3)
        lstm_layers.append({
            # stored (in, 4H): PyTorch weight_ih_l{k} is (4H, in) -> transposed
            "w_ih": 0.1 * jax.random.normal(k1, (in_dim, 4 * hidden_dim), jnp.float32),
            "w_hh": 0.1 * jax.random.normal(k2, (hidden_dim, 4 * hidden_dim), jnp.float32),
            # bias = b_ih + b_hh folded together, kept 2D for TPU friendliness
            "bias": 0.1 * jax.random.normal(k3, (1, 4 * hidden_dim), jnp.float32),
        })
        in_dim = hidden_dim
    params["lstm"] = lstm_layers

    head_params = []
    for idx, name in enumerate(("action", "duration", "distance")):
        V = name_vocab_size[name]
        k1, k2, k3, k4 = jax.random.split(ks[1 + num_layers + idx], 4)
        head_params.append((
            0.1 * jax.random.normal(k1, (hidden_dim, hidden_dim), jnp.float32),
            0.1 * jax.random.normal(k2, (1, hidden_dim), jnp.float32),
            0.1 * jax.random.normal(k3, (hidden_dim, V), jnp.float32),
            0.1 * jax.random.normal(k4, (1, V), jnp.float32),
        ))
    params["heads"] = head_params
    return params


if __name__ == "__main__":
    # Small config consistent with the module's __init__.
    vocab_size = 32
    embed_size = 16
    hidden_dim = 32
    num_layers = 1
    name_vocab_size = {"action": 8, "duration": 6, "distance": 5}
    B, T = 2, 8

    key = jax.random.PRNGKey(0)
    k_param, k_tok = jax.random.split(key)
    params = init_params(k_param, vocab_size, embed_size, hidden_dim,
                         num_layers, name_vocab_size)
    token_ids = jax.random.randint(k_tok, (B, T), 0, vocab_size, dtype=jnp.int32)

    y1, y2, y3 = action_lstm_forward(token_ids, params)
    jax.block_until_ready((y1, y2, y3))

    r1, r2, r3 = reference_forward(token_ids, params)
    assert y1.shape == (B, name_vocab_size["action"])
    assert y2.shape == (B, name_vocab_size["duration"])
    assert y3.shape == (B, name_vocab_size["distance"])
    assert jnp.allclose(y1, r1, atol=1e-4, rtol=1e-4)
    assert jnp.allclose(y2, r2, atol=1e-4, rtol=1e-4)
    assert jnp.allclose(y3, r3, atol=1e-4, rtol=1e-4)

    print("KERNEL_OK")
</pallas_src>

<mosaic_0001>
module attributes {stable_mosaic.version = 11 : i64} {
  func.func @kernel(%arg0: i32, %arg1: memref<2x8xi32, #tpu.memory_space<smem>>, %arg2: memref<32x16xf32, #tpu.memory_space<vmem>>, %arg3: memref<16x128xf32, #tpu.memory_space<vmem>>, %arg4: memref<32x128xf32, #tpu.memory_space<vmem>>, %arg5: memref<1x128xf32, #tpu.memory_space<vmem>>, %arg6: memref<32x128xf32, #tpu.memory_space<vmem>>, %arg7: memref<1x128xf32, #tpu.memory_space<vmem>>, %arg8: memref<128x128xf32, #tpu.memory_space<vmem>>, %arg9: memref<1x128xf32, #tpu.memory_space<vmem>>, %arg10: memref<2x128xf32, #tpu.memory_space<vmem>>, %arg11: memref<32x128xf32, #tpu.memory_space<vmem>>) attributes {dimension_semantics = [#tpu.dimension_semantics<arbitrary>], iteration_bounds = array<i64: 1>, scalar_prefetch = 1 : i64, scratch_operands = 1 : i64, tpu.core_type = #tpu.core_type<tc>, window_params = [{pipeline_mode = #tpu.pipeline_mode<synchronous>, transform_indices = @transform_0, window_bounds = array<i64: 32, 16>}, {pipeline_mode = #tpu.pipeline_mode<synchronous>, transform_indices = @transform_1, window_bounds = array<i64: 16, 128>}, {pipeline_mode = #tpu.pipeline_mode<synchronous>, transform_indices = @transform_2, window_bounds = array<i64: 32, 128>}, {pipeline_mode = #tpu.pipeline_mode<synchronous>, transform_indices = @transform_3, window_bounds = array<i64: 1, 128>}, {pipeline_mode = #tpu.pipeline_mode<synchronous>, transform_indices = @transform_4, window_bounds = array<i64: 32, 128>}, {pipeline_mode = #tpu.pipeline_mode<synchronous>, transform_indices = @transform_5, window_bounds = array<i64: 1, 128>}, {pipeline_mode = #tpu.pipeline_mode<synchronous>, transform_indices = @transform_6, window_bounds = array<i64: 128, 128>}, {pipeline_mode = #tpu.pipeline_mode<synchronous>, transform_indices = @transform_7, window_bounds = array<i64: 1, 128>}, {pipeline_mode = #tpu.pipeline_mode<synchronous>, transform_indices = @transform_8, window_bounds = array<i64: 2, 128>}]} {
    %c0 = arith.constant 0 : index
    %c0_0 = arith.constant 0 : index
    %0 = vector.load %arg2[%c0, %c0_0] : memref<32x16xf32, #tpu.memory_space<vmem>>, vector<32x16xf32>
    %c0_1 = arith.constant 0 : index
    %c0_2 = arith.constant 0 : index
    %1 = vector.load %arg3[%c0_1, %c0_2] : memref<16x128xf32, #tpu.memory_space<vmem>>, vector<16x128xf32>
    %cst = arith.constant dense<0.000000e+00> : vector<32x128xf32>
    %2 = tpu.matmul %0, %1, %cst {dimension_numbers = #tpu.dot_dimension_numbers<[1], [0], [0], [1], [0, 0, 1, 1], [], []>} : vector<32x16xf32>, vector<16x128xf32>, vector<32x128xf32> -> vector<32x128xf32>
    %c0_3 = arith.constant 0 : index
    %c0_4 = arith.constant 0 : index
    %3 = vector.load %arg5[%c0_3, %c0_4] : memref<1x128xf32, #tpu.memory_space<vmem>>, vector<1x128xf32>
    %4 = vector.broadcast %3 : vector<1x128xf32> to vector<32x128xf32>
    %5 = arith.addf %2, %4 : vector<32x128xf32>
    %c0_5 = arith.constant 0 : index
    %c0_6 = arith.constant 0 : index
    %6 = vector.load %arg11[%c0_5, %c0_6] : memref<32x128xf32, #tpu.memory_space<vmem>>, vector<32x128xf32>
    tpu.vector_store %arg11[%c0_5, %c0_6], %5 {strides = array<i32>} : memref<32x128xf32, #tpu.memory_space<vmem>>, vector<32x128xf32>,
    %cst_7 = arith.constant 0.000000e+00 : f32
    %7 = vector.broadcast %cst_7 : f32 to vector<2x32xf32>
    %c0_i32 = arith.constant 0 : i32
    %c0_8 = arith.constant 0 : index
    %8 = arith.index_cast %c0_i32 : i32 to index
    %9 = memref.load %arg1[%c0_8, %8] : memref<2x8xi32, #tpu.memory_space<smem>>
    %10 = arith.index_cast %9 : i32 to index
    %c0_9 = arith.constant 0 : index
    %11 = vector.load %arg11[%10, %c0_9] : memref<32x128xf32, #tpu.memory_space<vmem>>, vector<1x128xf32>
    %c1 = arith.constant 1 : index
    %12 = arith.index_cast %c0_i32 : i32 to index
    %13 = memref.load %arg1[%c1, %12] : memref<2x8xi32, #tpu.memory_space<smem>>
    %14 = arith.index_cast %13 : i32 to index
    %c0_10 = arith.constant 0 : index
    %15 = vector.load %arg11[%14, %c0_10] : memref<32x128xf32, #tpu.memory_space<vmem>>, vector<1x128xf32>
    %16 = tpu.concatenate %11, %15 in 0 : vector<1x128xf32>, vector<1x128xf32> -> vector<2x128xf32>
    %c0_11 = arith.constant 0 : index
    %c0_12 = arith.constant 0 : index
    %17 = vector.load %arg4[%c0_11, %c0_12] : memref<32x128xf32, #tpu.memory_space<vmem>>, vector<32x128xf32>
    %cst_13 = arith.constant dense<0.000000e+00> : vector<2x128xf32>
    %18 = tpu.matmul %7, %17, %cst_13 {dimension_numbers = #tpu.dot_dimension_numbers<[1], [0], [0], [1], [0, 0, 1, 1], [], []>} : vector<2x32xf32>, vector<32x128xf32>, vector<2x128xf32> -> vector<2x128xf32>
    %19 = arith.addf %16, %18 : vector<2x128xf32>
    %20 = vector.extract_strided_slice %19 {offsets = [0, 0], sizes = [2, 32], strides = [1, 1]} : vector<2x128xf32> to vector<2x32xf32>
    %21 = arith.negf %20 : vector<2x32xf32>
    %22 = math.exp %21 : vector<2x32xf32>
    %cst_14 = arith.constant 1.000000e+00 : f32
    %23 = vector.broadcast %cst_14 : f32 to vector<2x32xf32>
    %24 = arith.addf %23, %22 : vector<2x32xf32>
    %25 = arith.divf %23, %24 : vector<2x32xf32>
    %26 = vector.extract_strided_slice %19 {offsets = [0, 32], sizes = [2, 32], strides = [1, 1]} : vector<2x128xf32> to vector<2x32xf32>
    %27 = arith.negf %26 : vector<2x32xf32>
    %28 = math.exp %27 : vector<2x32xf32>
    %cst_15 = arith.constant 1.000000e+00 : f32
    %29 = vector.broadcast %cst_15 : f32 to vector<2x32xf32>
    %30 = arith.addf %29, %28 : vector<2x32xf32>
    %31 = arith.divf %29, %30 : vector<2x32xf32>
    %32 = vector.extract_strided_slice %19 {offsets = [0, 64], sizes = [2, 32], strides = [1, 1]} : vector<2x128xf32> to vector<2x32xf32>
    %33 = math.tanh %32 : vector<2x32xf32>
    %34 = vector.extract_strided_slice %19 {offsets = [0, 96], sizes = [2, 32], strides = [1, 1]} : vector<2x128xf32> to vector<2x32xf32>
    %35 = arith.negf %34 : vector<2x32xf32>
    %36 = math.exp %35 : vector<2x32xf32>
    %cst_16 = arith.constant 1.000000e+00 : f32
    %37 = vector.broadcast %cst_16 : f32 to vector<2x32xf32>
    %38 = arith.addf %37, %36 : vector<2x32xf32>
    %39 = arith.divf %37, %38 : vector<2x32xf32>
    %40 = arith.mulf %31, %7 : vector<2x32xf32>
    %41 = arith.mulf %25, %33 : vector<2x32xf32>
    %42 = arith.addf %40, %41 : vector<2x32xf32>
    %43 = math.tanh %42 : vector<2x32xf32>
    %44 = arith.mulf %39, %43 : vector<2x32xf32>
    %c1_i32 = arith.constant 1 : i32
    %c0_17 = arith.constant 0 : index
    %45 = arith.index_cast %c1_i32 : i32 to index
    %46 = memref.load %arg1[%c0_17, %45] : memref<2x8xi32, #tpu.memory_space<smem>>
    %47 = arith.index_cast %46 : i32 to index
    %c0_18 = arith.constant 0 : index
    %48 = vector.load %arg11[%47, %c0_18] : memref<32x128xf32, #tpu.memory_space<vmem>>, vector<1x128xf32>
    %c1_19 = arith.constant 1 : index
    %49 = arith.index_cast %c1_i32 : i32 to index
    %50 = memref.load %arg1[%c1_19, %49] : memref<2x8xi32, #tpu.memory_space<smem>>
    %51 = arith.index_cast %50 : i32 to index
    %c0_20 = arith.constant 0 : index
    %52 = vector.load %arg11[%51, %c0_20] : memref<32x128xf32, #tpu.memory_space<vmem>>, vector<1x128xf32>
    %53 = tpu.concatenate %48, %52 in 0 : vector<1x128xf32>, vector<1x128xf32> -> vector<2x128xf32>
    %c0_21 = arith.constant 0 : index
    %c0_22 = arith.constant 0 : index
    %54 = vector.load %arg4[%c0_21, %c0_22] : memref<32x128xf32, #tpu.memory_space<vmem>>, vector<32x128xf32>
    %cst_23 = arith.constant dense<0.000000e+00> : vector<2x128xf32>
    %55 = tpu.matmul %44, %54, %cst_23 {dimension_numbers = #tpu.dot_dimension_numbers<[1], [0], [0], [1], [0, 0, 1, 1], [], []>} : vector<2x32xf32>, vector<32x128xf32>, vector<2x128xf32> -> vector<2x128xf32>
    %56 = arith.addf %53, %55 : vector<2x128xf32>
    %57 = vector.extract_strided_slice %56 {offsets = [0, 0], sizes = [2, 32], strides = [1, 1]} : vector<2x128xf32> to vector<2x32xf32>
    %58 = arith.negf %57 : vector<2x32xf32>
    %59 = math.exp %58 : vector<2x32xf32>
    %cst_24 = arith.constant 1.000000e+00 : f32
    %60 = vector.broadcast %cst_24 : f32 to vector<2x32xf32>
    %61 = arith.addf %60, %59 : vector<2x32xf32>
    %62 = arith.divf %60, %61 : vector<2x32xf32>
    %63 = vector.extract_strided_slice %56 {offsets = [0, 32], sizes = [2, 32], strides = [1, 1]} : vector<2x128xf32> to vector<2x32xf32>
    %64 = arith.negf %63 : vector<2x32xf32>
    %65 = math.exp %64 : vector<2x32xf32>
    %cst_25 = arith.constant 1.000000e+00 : f32
    %66 = vector.broadcast %cst_25 : f32 to vector<2x32xf32>
    %67 = arith.addf %66, %65 : vector<2x32xf32>
    %68 = arith.divf %66, %67 : vector<2x32xf32>
    %69 = vector.extract_strided_slice %56 {offsets = [0, 64], sizes = [2, 32], strides = [1, 1]} : vector<2x128xf32> to vector<2x32xf32>
    %70 = math.tanh %69 : vector<2x32xf32>
    %71 = vector.extract_strided_slice %56 {offsets = [0, 96], sizes = [2, 32], strides = [1, 1]} : vector<2x128xf32> to vector<2x32xf32>
    %72 = arith.negf %71 : vector<2x32xf32>
    %73 = math.exp %72 : vector<2x32xf32>
    %cst_26 = arith.constant 1.000000e+00 : f32
    %74 = vector.broadcast %cst_26 : f32 to vector<2x32xf32>
    %75 = arith.addf %74, %73 : vector<2x32xf32>
    %76 = arith.divf %74, %75 : vector<2x32xf32>
    %77 = arith.mulf %68, %42 : vector<2x32xf32>
    %78 = arith.mulf %62, %70 : vector<2x32xf32>
    %79 = arith.addf %77, %78 : vector<2x32xf32>
    %80 = math.tanh %79 : vector<2x32xf32>
    %81 = arith.mulf %76, %80 : vector<2x32xf32>
    %c2_i32 = arith.constant 2 : i32
    %c0_27 = arith.constant 0 : index
    %82 = arith.index_cast %c2_i32 : i32 to index
    %83 = memref.load %arg1[%c0_27, %82] : memref<2x8xi32, #tpu.memory_space<smem>>
    %84 = arith.index_cast %83 : i32 to index
    %c0_28 = arith.constant 0 : index
    %85 = vector.load %arg11[%84, %c0_28] : memref<32x128xf32, #tpu.memory_space<vmem>>, vector<1x128xf32>
    %c1_29 = arith.constant 1 : index
    %86 = arith.index_cast %c2_i32 : i32 to index
    %87 = memref.load %arg1[%c1_29, %86] : memref<2x8xi32, #tpu.memory_space<smem>>
    %88 = arith.index_cast %87 : i32 to index
    %c0_30 = arith.constant 0 : index
    %89 = vector.load %arg11[%88, %c0_30] : memref<32x128xf32, #tpu.memory_space<vmem>>, vector<1x128xf32>
    %90 = tpu.concatenate %85, %89 in 0 : vector<1x128xf32>, vector<1x128xf32> -> vector<2x128xf32>
    %c0_31 = arith.constant 0 : index
    %c0_32 = arith.constant 0 : index
    %91 = vector.load %arg4[%c0_31, %c0_32] : memref<32x128xf32, #tpu.memory_space<vmem>>, vector<32x128xf32>
    %cst_33 = arith.constant dense<0.000000e+00> : vector<2x128xf32>
    %92 = tpu.matmul %81, %91, %cst_33 {dimension_numbers = #tpu.dot_dimension_numbers<[1], [0], [0], [1], [0, 0, 1, 1], [], []>} : vector<2x32xf32>, vector<32x128xf32>, vector<2x128xf32> -> vector<2x128xf32>
    %93 = arith.addf %90, %92 : vector<2x128xf32>
    %94 = vector.extract_strided_slice %93 {offsets = [0, 0], sizes = [2, 32], strides = [1, 1]} : vector<2x128xf32> to vector<2x32xf32>
    %95 = arith.negf %94 : vector<2x32xf32>
    %96 = math.exp %95 : vector<2x32xf32>
    %cst_34 = arith.constant 1.000000e+00 : f32
    %97 = vector.broadcast %cst_34 : f32 to vector<2x32xf32>
    %98 = arith.addf %97, %96 : vector<2x32xf32>
    %99 = arith.divf %97, %98 : vector<2x32xf32>
    %100 = vector.extract_strided_slice %93 {offsets = [0, 32], sizes = [2, 32], strides = [1, 1]} : vector<2x128xf32> to vector<2x32xf32>
    %101 = arith.negf %100 : vector<2x32xf32>
    %102 = math.exp %101 : vector<2x32xf32>
    %cst_35 = arith.constant 1.000000e+00 : f32
    %103 = vector.broadcast %cst_35 : f32 to vector<2x32xf32>
    %104 = arith.addf %103, %102 : vector<2x32xf32>
    %105 = arith.divf %103, %104 : vector<2x32xf32>
    %106 = vector.extract_strided_slice %93 {offsets = [0, 64], sizes = [2, 32], strides = [1, 1]} : vector<2x128xf32> to vector<2x32xf32>
    %107 = math.tanh %106 : vector<2x32xf32>
    %108 = vector.extract_strided_slice %93 {offsets = [0, 96], sizes = [2, 32], strides = [1, 1]} : vector<2x128xf32> to vector<2x32xf32>
    %109 = arith.negf %108 : vector<2x32xf32>
    %110 = math.exp %109 : vector<2x32xf32>
    %cst_36 = arith.constant 1.000000e+00 : f32
    %111 = vector.broadcast %cst_36 : f32 to vector<2x32xf32>
    %112 = arith.addf %111, %110 : vector<2x32xf32>
    %113 = arith.divf %111, %112 : vector<2x32xf32>
    %114 = arith.mulf %105, %79 : vector<2x32xf32>
    %115 = arith.mulf %99, %107 : vector<2x32xf32>
    %116 = arith.addf %114, %115 : vector<2x32xf32>
    %117 = math.tanh %116 : vector<2x32xf32>
    %118 = arith.mulf %113, %117 : vector<2x32xf32>
    %c3_i32 = arith.constant 3 : i32
    %c0_37 = arith.constant 0 : index
    %119 = arith.index_cast %c3_i32 : i32 to index
    %120 = memref.load %arg1[%c0_37, %119] : memref<2x8xi32, #tpu.memory_space<smem>>
    %121 = arith.index_cast %120 : i32 to index
    %c0_38 = arith.constant 0 : index
    %122 = vector.load %arg11[%121, %c0_38] : memref<32x128xf32, #tpu.memory_space<vmem>>, vector<1x128xf32>
    %c1_39 = arith.constant 1 : index
    %123 = arith.index_cast %c3_i32 : i32 to index
    %124 = memref.load %arg1[%c1_39, %123] : memref<2x8xi32, #tpu.memory_space<smem>>
    %125 = arith.index_cast %124 : i32 to index
    %c0_40 = arith.constant 0 : index
    %126 = vector.load %arg11[%125, %c0_40] : memref<32x128xf32, #tpu.memory_space<vmem>>, vector<1x128xf32>
    %127 = tpu.concatenate %122, %126 in 0 : vector<1x128xf32>, vector<1x128xf32> -> vector<2x128xf32>
    %c0_41 = arith.constant 0 : index
    %c0_42 = arith.constant 0 : index
    %128 = vector.load %arg4[%c0_41, %c0_42] : memref<32x128xf32, #tpu.memory_space<vmem>>, vector<32x128xf32>
    %cst_43 = arith.constant dense<0.000000e+00> : vector<2x128xf32>
    %129 = tpu.matmul %118, %128, %cst_43 {dimension_numbers = #tpu.dot_dimension_numbers<[1], [0], [0], [1], [0, 0, 1, 1], [], []>} : vector<2x32xf32>, vector<32x128xf32>, vector<2x128xf32> -> vector<2x128xf32>
    %130 = arith.addf %127, %129 : vector<2x128xf32>
    %131 = vector.extract_strided_slice %130 {offsets = [0, 0], sizes = [2, 32], strides = [1, 1]} : vector<2x128xf32> to vector<2x32xf32>
    %132 = arith.negf %131 : vector<2x32xf32>
    %133 = math.exp %132 : vector<2x32xf32>
    %cst_44 = arith.constant 1.000000e+00 : f32
    %134 = vector.broadcast %cst_44 : f32 to vector<2x32xf32>
    %135 = arith.addf %134, %133 : vector<2x32xf32>
    %136 = arith.divf %134, %135 : vector<2x32xf32>
    %137 = vector.extract_strided_slice %130 {offsets = [0, 32], sizes = [2, 32], strides = [1, 1]} : vector<2x128xf32> to vector<2x32xf32>
    %138 = arith.negf %137 : vector<2x32xf32>
    %139 = math.exp %138 : vector<2x32xf32>
    %cst_45 = arith.constant 1.000000e+00 : f32
    %140 = vector.broadcast %cst_45 : f32 to vector<2x32xf32>
    %141 = arith.addf %140, %139 : vector<2x32xf32>
    %142 = arith.divf %140, %141 : vector<2x32xf32>
    %143 = vector.extract_strided_slice %130 {offsets = [0, 64], sizes = [2, 32], strides = [1, 1]} : vector<2x128xf32> to vector<2x32xf32>
    %144 = math.tanh %143 : vector<2x32xf32>
    %145 = vector.extract_strided_slice %130 {offsets = [0, 96], sizes = [2, 32], strides = [1, 1]} : vector<2x128xf32> to vector<2x32xf32>
    %146 = arith.negf %145 : vector<2x32xf32>
    %147 = math.exp %146 : vector<2x32xf32>
    %cst_46 = arith.constant 1.000000e+00 : f32
    %148 = vector.broadcast %cst_46 : f32 to vector<2x32xf32>
    %149 = arith.addf %148, %147 : vector<2x32xf32>
    %150 = arith.divf %148, %149 : vector<2x32xf32>
    %151 = arith.mulf %142, %116 : vector<2x32xf32>
    %152 = arith.mulf %136, %144 : vector<2x32xf32>
    %153 = arith.addf %151, %152 : vector<2x32xf32>
    %154 = math.tanh %153 : vector<2x32xf32>
    %155 = arith.mulf %150, %154 : vector<2x32xf32>
    %c4_i32 = arith.constant 4 : i32
    %c0_47 = arith.constant 0 : index
    %156 = arith.index_cast %c4_i32 : i32 to index
    %157 = memref.load %arg1[%c0_47, %156] : memref<2x8xi32, #tpu.memory_space<smem>>
    %158 = arith.index_cast %157 : i32 to index
    %c0_48 = arith.constant 0 : index
    %159 = vector.load %arg11[%158, %c0_48] : memref<32x128xf32, #tpu.memory_space<vmem>>, vector<1x128xf32>
    %c1_49 = arith.constant 1 : index
    %160 = arith.index_cast %c4_i32 : i32 to index
    %161 = memref.load %arg1[%c1_49, %160] : memref<2x8xi32, #tpu.memory_space<smem>>
    %162 = arith.index_cast %161 : i32 to index
    %c0_50 = arith.constant 0 : index
    %163 = vector.load %arg11[%162, %c0_50] : memref<32x128xf32, #tpu.memory_space<vmem>>, vector<1x128xf32>
    %164 = tpu.concatenate %159, %163 in 0 : vector<1x128xf32>, vector<1x128xf32> -> vector<2x128xf32>
    %c0_51 = arith.constant 0 : index
    %c0_52 = arith.constant 0 : index
    %165 = vector.load %arg4[%c0_51, %c0_52] : memref<32x128xf32, #tpu.memory_space<vmem>>, vector<32x128xf32>
    %cst_53 = arith.constant dense<0.000000e+00> : vector<2x128xf32>
    %166 = tpu.matmul %155, %165, %cst_53 {dimension_numbers = #tpu.dot_dimension_numbers<[1], [0], [0], [1], [0, 0, 1, 1], [], []>} : vector<2x32xf32>, vector<32x128xf32>, vector<2x128xf32> -> vector<2x128xf32>
    %167 = arith.addf %164, %166 : vector<2x128xf32>
    %168 = vector.extract_strided_slice %167 {offsets = [0, 0], sizes = [2, 32], strides = [1, 1]} : vector<2x128xf32> to vector<2x32xf32>
    %169 = arith.negf %168 : vector<2x32xf32>
    %170 = math.exp %169 : vector<2x32xf32>
    %cst_54 = arith.constant 1.000000e+00 : f32
    %171 = vector.broadcast %cst_54 : f32 to vector<2x32xf32>
    %172 = arith.addf %171, %170 : vector<2x32xf32>
    %173 = arith.divf %171, %172 : vector<2x32xf32>
    %174 = vector.extract_strided_slice %167 {offsets = [0, 32], sizes = [2, 32], strides = [1, 1]} : vector<2x128xf32> to vector<2x32xf32>
    %175 = arith.negf %174 : vector<2x32xf32>
    %176 = math.exp %175 : vector<2x32xf32>
    %cst_55 = arith.constant 1.000000e+00 : f32
    %177 = vector.broadcast %cst_55 : f32 to vector<2x32xf32>
    %178 = arith.addf %177, %176 : vector<2x32xf32>
    %179 = arith.divf %177, %178 : vector<2x32xf32>
    %180 = vector.extract_strided_slice %167 {offsets = [0, 64], sizes = [2, 32], strides = [1, 1]} : vector<2x128xf32> to vector<2x32xf32>
    %181 = math.tanh %180 : vector<2x32xf32>
    %182 = vector.extract_strided_slice %167 {offsets = [0, 96], sizes = [2, 32], strides = [1, 1]} : vector<2x128xf32> to vector<2x32xf32>
    %183 = arith.negf %182 : vector<2x32xf32>
    %184 = math.exp %183 : vector<2x32xf32>
    %cst_56 = arith.constant 1.000000e+00 : f32
    %185 = vector.broadcast %cst_56 : f32 to vector<2x32xf32>
    %186 = arith.addf %185, %184 : vector<2x32xf32>
    %187 = arith.divf %185, %186 : vector<2x32xf32>
    %188 = arith.mulf %179, %153 : vector<2x32xf32>
    %189 = arith.mulf %173, %181 : vector<2x32xf32>
    %190 = arith.addf %188, %189 : vector<2x32xf32>
    %191 = math.tanh %190 : vector<2x32xf32>
    %192 = arith.mulf %187, %191 : vector<2x32xf32>
    %c5_i32 = arith.constant 5 : i32
    %c0_57 = arith.constant 0 : index
    %193 = arith.index_cast %c5_i32 : i32 to index
    %194 = memref.load %arg1[%c0_57, %193] : memref<2x8xi32, #tpu.memory_space<smem>>
    %195 = arith.index_cast %194 : i32 to index
    %c0_58 = arith.constant 0 : index
    %196 = vector.load %arg11[%195, %c0_58] : memref<32x128xf32, #tpu.memory_space<vmem>>, vector<1x128xf32>
    %c1_59 = arith.constant 1 : index
    %197 = arith.index_cast %c5_i32 : i32 to index
    %198 = memref.load %arg1[%c1_59, %197] : memref<2x8xi32, #tpu.memory_space<smem>>
    %199 = arith.index_cast %198 : i32 to index
    %c0_60 = arith.constant 0 : index
    %200 = vector.load %arg11[%199, %c0_60] : memref<32x128xf32, #tpu.memory_space<vmem>>, vector<1x128xf32>
    %201 = tpu.concatenate %196, %200 in 0 : vector<1x128xf32>, vector<1x128xf32> -> vector<2x128xf32>
    %c0_61 = arith.constant 0 : index
    %c0_62 = arith.constant 0 : index
    %202 = vector.load %arg4[%c0_61, %c0_62] : memref<32x128xf32, #tpu.memory_space<vmem>>, vector<32x128xf32>
    %cst_63 = arith.constant dense<0.000000e+00> : vector<2x128xf32>
    %203 = tpu.matmul %192, %202, %cst_63 {dimension_numbers = #tpu.dot_dimension_numbers<[1], [0], [0], [1], [0, 0, 1, 1], [], []>} : vector<2x32xf32>, vector<32x128xf32>, vector<2x128xf32> -> vector<2x128xf32>
    %204 = arith.addf %201, %203 : vector<2x128xf32>
    %205 = vector.extract_strided_slice %204 {offsets = [0, 0], sizes = [2, 32], strides = [1, 1]} : vector<2x128xf32> to vector<2x32xf32>
    %206 = arith.negf %205 : vector<2x32xf32>
    %207 = math.exp %206 : vector<2x32xf32>
    %cst_64 = arith.constant 1.000000e+00 : f32
    %208 = vector.broadcast %cst_64 : f32 to vector<2x32xf32>
    %209 = arith.addf %208, %207 : vector<2x32xf32>
    %210 = arith.divf %208, %209 : vector<2x32xf32>
    %211 = vector.extract_strided_slice %204 {offsets = [0, 32], sizes = [2, 32], strides = [1, 1]} : vector<2x128xf32> to vector<2x32xf32>
    %212 = arith.negf %211 : vector<2x32xf32>
    %213 = math.exp %212 : vector<2x32xf32>
    %cst_65 = arith.constant 1.000000e+00 : f32
    %214 = vector.broadcast %cst_65 : f32 to vector<2x32xf32>
    %215 = arith.addf %214, %213 : vector<2x32xf32>
    %216 = arith.divf %214, %215 : vector<2x32xf32>
    %217 = vector.extract_strided_slice %204 {offsets = [0, 64], sizes = [2, 32], strides = [1, 1]} : vector<2x128xf32> to vector<2x32xf32>
    %218 = math.tanh %217 : vector<2x32xf32>
    %219 = vector.extract_strided_slice %204 {offsets = [0, 96], sizes = [2, 32], strides = [1, 1]} : vector<2x128xf32> to vector<2x32xf32>
    %220 = arith.negf %219 : vector<2x32xf32>
    %221 = math.exp %220 : vector<2x32xf32>
    %cst_66 = arith.constant 1.000000e+00 : f32
    %222 = vector.broadcast %cst_66 : f32 to vector<2x32xf32>
    %223 = arith.addf %222, %221 : vector<2x32xf32>
    %224 = arith.divf %222, %223 : vector<2x32xf32>
    %225 = arith.mulf %216, %190 : vector<2x32xf32>
    %226 = arith.mulf %210, %218 : vector<2x32xf32>
    %227 = arith.addf %225, %226 : vector<2x32xf32>
    %228 = math.tanh %227 : vector<2x32xf32>
    %229 = arith.mulf %224, %228 : vector<2x32xf32>
    %c6_i32 = arith.constant 6 : i32
    %c0_67 = arith.constant 0 : index
    %230 = arith.index_cast %c6_i32 : i32 to index
    %231 = memref.load %arg1[%c0_67, %230] : memref<2x8xi32, #tpu.memory_space<smem>>
    %232 = arith.index_cast %231 : i32 to index
    %c0_68 = arith.constant 0 : index
    %233 = vector.load %arg11[%232, %c0_68] : memref<32x128xf32, #tpu.memory_space<vmem>>, vector<1x128xf32>
    %c1_69 = arith.constant 1 : index
    %234 = arith.index_cast %c6_i32 : i32 to index
    %235 = memref.load %arg1[%c1_69, %234] : memref<2x8xi32, #tpu.memory_space<smem>>
    %236 = arith.index_cast %235 : i32 to index
    %c0_70 = arith.constant 0 : index
    %237 = vector.load %arg11[%236, %c0_70] : memref<32x128xf32, #tpu.memory_space<vmem>>, vector<1x128xf32>
    %238 = tpu.concatenate %233, %237 in 0 : vector<1x128xf32>, vector<1x128xf32> -> vector<2x128xf32>
    %c0_71 = arith.constant 0 : index
    %c0_72 = arith.constant 0 : index
    %239 = vector.load %arg4[%c0_71, %c0_72] : memref<32x128xf32, #tpu.memory_space<vmem>>, vector<32x128xf32>
    %cst_73 = arith.constant dense<0.000000e+00> : vector<2x128xf32>
    %240 = tpu.matmul %229, %239, %cst_73 {dimension_numbers = #tpu.dot_dimension_numbers<[1], [0], [0], [1], [0, 0, 1, 1], [], []>} : vector<2x32xf32>, vector<32x128xf32>, vector<2x128xf32> -> vector<2x128xf32>
    %241 = arith.addf %238, %240 : vector<2x128xf32>
    %242 = vector.extract_strided_slice %241 {offsets = [0, 0], sizes = [2, 32], strides = [1, 1]} : vector<2x128xf32> to vector<2x32xf32>
    %243 = arith.negf %242 : vector<2x32xf32>
    %244 = math.exp %243 : vector<2x32xf32>
    %cst_74 = arith.constant 1.000000e+00 : f32
    %245 = vector.broadcast %cst_74 : f32 to vector<2x32xf32>
    %246 = arith.addf %245, %244 : vector<2x32xf32>
    %247 = arith.divf %245, %246 : vector<2x32xf32>
    %248 = vector.extract_strided_slice %241 {offsets = [0, 32], sizes = [2, 32], strides = [1, 1]} : vector<2x128xf32> to vector<2x32xf32>
    %249 = arith.negf %248 : vector<2x32xf32>
    %250 = math.exp %249 : vector<2x32xf32>
    %cst_75 = arith.constant 1.000000e+00 : f32
    %251 = vector.broadcast %cst_75 : f32 to vector<2x32xf32>
    %252 = arith.addf %251, %250 : vector<2x32xf32>
    %253 = arith.divf %251, %252 : vector<2x32xf32>
    %254 = vector.extract_strided_slice %241 {offsets = [0, 64], sizes = [2, 32], strides = [1, 1]} : vector<2x128xf32> to vector<2x32xf32>
    %255 = math.tanh %254 : vector<2x32xf32>
    %256 = vector.extract_strided_slice %241 {offsets = [0, 96], sizes = [2, 32], strides = [1, 1]} : vector<2x128xf32> to vector<2x32xf32>
    %257 = arith.negf %256 : vector<2x32xf32>
    %258 = math.exp %257 : vector<2x32xf32>
    %cst_76 = arith.constant 1.000000e+00 : f32
    %259 = vector.broadcast %cst_76 : f32 to vector<2x32xf32>
    %260 = arith.addf %259, %258 : vector<2x32xf32>
    %261 = arith.divf %259, %260 : vector<2x32xf32>
    %262 = arith.mulf %253, %227 : vector<2x32xf32>
    %263 = arith.mulf %247, %255 : vector<2x32xf32>
    %264 = arith.addf %262, %263 : vector<2x32xf32>
    %265 = math.tanh %264 : vector<2x32xf32>
    %266 = arith.mulf %261, %265 : vector<2x32xf32>
    %c7_i32 = arith.constant 7 : i32
    %c0_77 = arith.constant 0 : index
    %267 = arith.index_cast %c7_i32 : i32 to index
    %268 = memref.load %arg1[%c0_77, %267] : memref<2x8xi32, #tpu.memory_space<smem>>
    %269 = arith.index_cast %268 : i32 to index
    %c0_78 = arith.constant 0 : index
    %270 = vector.load %arg11[%269, %c0_78] : memref<32x128xf32, #tpu.memory_space<vmem>>, vector<1x128xf32>
    %c1_79 = arith.constant 1 : index
    %271 = arith.index_cast %c7_i32 : i32 to index
    %272 = memref.load %arg1[%c1_79, %271] : memref<2x8xi32, #tpu.memory_space<smem>>
    %273 = arith.index_cast %272 : i32 to index
    %c0_80 = arith.constant 0 : index
    %274 = vector.load %arg11[%273, %c0_80] : memref<32x128xf32, #tpu.memory_space<vmem>>, vector<1x128xf32>
    %275 = tpu.concatenate %270, %274 in 0 : vector<1x128xf32>, vector<1x128xf32> -> vector<2x128xf32>
    %c0_81 = arith.constant 0 : index
    %c0_82 = arith.constant 0 : index
    %276 = vector.load %arg4[%c0_81, %c0_82] : memref<32x128xf32, #tpu.memory_space<vmem>>, vector<32x128xf32>
    %cst_83 = arith.constant dense<0.000000e+00> : vector<2x128xf32>
    %277 = tpu.matmul %266, %276, %cst_83 {dimension_numbers = #tpu.dot_dimension_numbers<[1], [0], [0], [1], [0, 0, 1, 1], [], []>} : vector<2x32xf32>, vector<32x128xf32>, vector<2x128xf32> -> vector<2x128xf32>
    %278 = arith.addf %275, %277 : vector<2x128xf32>
    %279 = vector.extract_strided_slice %278 {offsets = [0, 0], sizes = [2, 32], strides = [1, 1]} : vector<2x128xf32> to vector<2x32xf32>
    %280 = arith.negf %279 : vector<2x32xf32>
    %281 = math.exp %280 : vector<2x32xf32>
    %cst_84 = arith.constant 1.000000e+00 : f32
    %282 = vector.broadcast %cst_84 : f32 to vector<2x32xf32>
    %283 = arith.addf %282, %281 : vector<2x32xf32>
    %284 = arith.divf %282, %283 : vector<2x32xf32>
    %285 = vector.extract_strided_slice %278 {offsets = [0, 32], sizes = [2, 32], strides = [1, 1]} : vector<2x128xf32> to vector<2x32xf32>
    %286 = arith.negf %285 : vector<2x32xf32>
    %287 = math.exp %286 : vector<2x32xf32>
    %cst_85 = arith.constant 1.000000e+00 : f32
    %288 = vector.broadcast %cst_85 : f32 to vector<2x32xf32>
    %289 = arith.addf %288, %287 : vector<2x32xf32>
    %290 = arith.divf %288, %289 : vector<2x32xf32>
    %291 = vector.extract_strided_slice %278 {offsets = [0, 64], sizes = [2, 32], strides = [1, 1]} : vector<2x128xf32> to vector<2x32xf32>
    %292 = math.tanh %291 : vector<2x32xf32>
    %293 = vector.extract_strided_slice %278 {offsets = [0, 96], sizes = [2, 32], strides = [1, 1]} : vector<2x128xf32> to vector<2x32xf32>
    %294 = arith.negf %293 : vector<2x32xf32>
    %295 = math.exp %294 : vector<2x32xf32>
    %cst_86 = arith.constant 1.000000e+00 : f32
    %296 = vector.broadcast %cst_86 : f32 to vector<2x32xf32>
    %297 = arith.addf %296, %295 : vector<2x32xf32>
    %298 = arith.divf %296, %297 : vector<2x32xf32>
    %299 = arith.mulf %290, %264 : vector<2x32xf32>
    %300 = arith.mulf %284, %292 : vector<2x32xf32>
    %301 = arith.addf %299, %300 : vector<2x32xf32>
    %302 = math.tanh %301 : vector<2x32xf32>
    %303 = arith.mulf %298, %302 : vector<2x32xf32>
    %c8_i32 = arith.constant 8 : i32
    %c0_87 = arith.constant 0 : index
    %c0_88 = arith.constant 0 : index
    %304 = vector.load %arg6[%c0_87, %c0_88] : memref<32x128xf32, #tpu.memory_space<vmem>>, vector<32x128xf32>
    %cst_89 = arith.constant dense<0.000000e+00> : vector<2x128xf32>
    %305 = tpu.matmul %303, %304, %cst_89 {dimension_numbers = #tpu.dot_dimension_numbers<[1], [0], [0], [1], [0, 0, 1, 1], [], []>} : vector<2x32xf32>, vector<32x128xf32>, vector<2x128xf32> -> vector<2x128xf32>
    %c0_90 = arith.constant 0 : index
    %c0_91 = arith.constant 0 : index
    %306 = vector.load %arg7[%c0_90, %c0_91] : memref<1x128xf32, #tpu.memory_space<vmem>>, vector<1x128xf32>
    %307 = vector.broadcast %306 : vector<1x128xf32> to vector<2x128xf32>
    %308 = arith.addf %305, %307 : vector<2x128xf32>
    %cst_92 = arith.constant 0.000000e+00 : f32
    %309 = vector.broadcast %cst_92 : f32 to vector<2x128xf32>
    %310 = arith.maximumf %308, %309 : vector<2x128xf32>
    %c0_93 = arith.constant 0 : index
    %c0_94 = arith.constant 0 : index
    %311 = vector.load %arg8[%c0_93, %c0_94] : memref<128x128xf32, #tpu.memory_space<vmem>>, vector<128x128xf32>
    %cst_95 = arith.constant dense<0.000000e+00> : vector<2x128xf32>
    %312 = tpu.matmul %310, %311, %cst_95 {dimension_numbers = #tpu.dot_dimension_numbers<[1], [0], [0], [1], [0, 0, 1, 1], [], []>} : vector<2x128xf32>, vector<128x128xf32>, vector<2x128xf32> -> vector<2x128xf32>
    %c0_96 = arith.constant 0 : index
    %c0_97 = arith.constant 0 : index
    %313 = vector.load %arg9[%c0_96, %c0_97] : memref<1x128xf32, #tpu.memory_space<vmem>>, vector<1x128xf32>
    %314 = vector.broadcast %313 : vector<1x128xf32> to vector<2x128xf32>
    %315 = arith.addf %312, %314 : vector<2x128xf32>
    %c0_98 = arith.constant 0 : index
    %c0_99 = arith.constant 0 : index
    %316 = vector.load %arg10[%c0_98, %c0_99] : memref<2x128xf32, #tpu.memory_space<vmem>>, vector<2x128xf32>
    tpu.vector_store %arg10[%c0_98, %c0_99], %315 {strides = array<i32>} : memref<2x128xf32, #tpu.memory_space<vmem>>, vector<2x128xf32>,
    return
  }
  func.func @transform_0(%arg0: i32, %arg1: memref<2x8xi32, #tpu.memory_space<smem>>) -> (i32, i32) {
    %c0_i32 = arith.constant 0 : i32
    %c0_i32_0 = arith.constant 0 : i32
    %c0_i32_1 = arith.constant 0 : i32
    return %c0_i32, %c0_i32_0 : i32, i32
  }
  func.func @transform_1(%arg0: i32, %arg1: memref<2x8xi32, #tpu.memory_space<smem>>) -> (i32, i32) {
    %c0_i32 = arith.constant 0 : i32
    %c0_i32_0 = arith.constant 0 : i32
    %c0_i32_1 = arith.constant 0 : i32
    return %c0_i32, %c0_i32_0 : i32, i32
  }
  func.func @transform_2(%arg0: i32, %arg1: memref<2x8xi32, #tpu.memory_space<smem>>) -> (i32, i32) {
    %c0_i32 = arith.constant 0 : i32
    %c0_i32_0 = arith.constant 0 : i32
    %c0_i32_1 = arith.constant 0 : i32
    return %c0_i32, %c0_i32_0 : i32, i32
  }
  func.func @transform_3(%arg0: i32, %arg1: memref<2x8xi32, #tpu.memory_space<smem>>) -> (i32, i32) {
    %c0_i32 = arith.constant 0 : i32
    %c0_i32_0 = arith.constant 0 : i32
    %c0_i32_1 = arith.constant 0 : i32
    return %c0_i32, %c0_i32_0 : i32, i32
  }
  func.func @transform_4(%arg0: i32, %arg1: memref<2x8xi32, #tpu.memory_space<smem>>) -> (i32, i32) {
    %c0_i32 = arith.constant 0 : i32
    %c0_i32_0 = arith.constant 0 : i32
    %c0_i32_1 = arith.constant 0 : i32
    return %c0_i32, %c0_i32_0 : i32, i32
  }
  func.func @transform_5(%arg0: i32, %arg1: memref<2x8xi32, #tpu.memory_space<smem>>) -> (i32, i32) {
    %c0_i32 = arith.constant 0 : i32
    %c0_i32_0 = arith.constant 0 : i32
    %c0_i32_1 = arith.constant 0 : i32
    return %c0_i32, %c0_i32_0 : i32, i32
  }
  func.func @transform_6(%arg0: i32, %arg1: memref<2x8xi32, #tpu.memory_space<smem>>) -> (i32, i32) {
    %c0_i32 = arith.constant 0 : i32
    %c0_i32_0 = arith.constant 0 : i32
    %c0_i32_1 = arith.constant 0 : i32
    return %c0_i32, %c0_i32_0 : i32, i32
  }
  func.func @transform_7(%arg0: i32, %arg1: memref<2x8xi32, #tpu.memory_space<smem>>) -> (i32, i32) {
    %c0_i32 = arith.constant 0 : i32
    %c0_i32_0 = arith.constant 0 : i32
    %c0_i32_1 = arith.constant 0 : i32
    return %c0_i32, %c0_i32_0 : i32, i32
  }
  func.func @transform_8(%arg0: i32, %arg1: memref<2x8xi32, #tpu.memory_space<smem>>) -> (i32, i32) {
    %c0_i32 = arith.constant 0 : i32
    %c0_i32_0 = arith.constant 0 : i32
    %c0_i32_1 = arith.constant 0 : i32
    return %c0_i32, %c0_i32_0 : i32, i32
  }
}

</mosaic_0001>

<bundles_post_ra>
// kernel: tpu_custom_call.1
= control target key start
LH: loop header
LB: loop body
LE: loop exit
PB: predicated region body
PF: predicated region fallthrough
CT: control target
= control target key end

     0   :  { %s2085_s0 = inlined_call_operand.vmem [shape: s32[2,8], index: 0, kind: input, shape index: {}]   ;;  %s2086_s1 = inlined_call_operand.vmem [shape: f32[32,16], index: 1, kind: input, shape index: {}]   ;;  %s2087_s2 = inlined_call_operand.hbm [shape: f32[16,128], index: 2, kind: input, shape index: {}]   ;;  %s2088_s3 = inlined_call_operand.vmem [shape: f32[32,128], index: 3, kind: input, shape index: {}]   ;;  %s2089_s4 = inlined_call_operand.hbm [shape: f32[1,128], index: 4, kind: input, shape index: {}]   ;;  %s2090_s5 = inlined_call_operand.vmem [shape: f32[32,128], index: 5, kind: input, shape index: {}]   ;;  %s2091_s6 = inlined_call_operand.vmem [shape: f32[1,128], index: 6, kind: input, shape index: {}]   ;;  %s2092_s7 = inlined_call_operand.hbm [shape: f32[128,128], index: 7, kind: input, shape index: {}]   ;;  %s2093_s8 = inlined_call_operand.vmem [shape: f32[1,128], index: 8, kind: input, shape index: {}]   ;;  %s2094_s9 = inlined_call_operand.hbm [shape: f32[2,128], index: 9, kind: output, shape index: {}]  }
   0x1   :  { %s14_s11 = sshll.u32 %s2085_s0, 4  ;;  %s15_s11 = int_to_ptr.vmem [resolvable:$true] %s14_s11 }
   0x2   :  { %s1696_s12 = scalar_lea.vmem %s15_s11, 32  ;;  %p1701_p1 = scmp.lt.s32.totalorder %s15_s11, %s15_s11 }
   0x3   :  { %p1697_p0 = scmp.ne.s32.totalorder %s15_s11, %s1696_s12  ;;  %p1702_p2 = scmp.lt.s32.totalorder %s1696_s12, %s1696_s12 }
   0x5   :  { %p1703_p3 = por %p1702_p2, %p1701_p1 }
   0x7   :  { %p1704_p4 = pnand %p1703_p3, %p1697_p0 }
   0x9   :  { %1707 = shalt.err (!%p1704_p4)  }
   0xa   :  { %s1804_s13 = smov [#allocation4]  }
   0xb   :  { %17 = dma.vmem_to_smem %s15_s11, 32, %s1804_s13, [#allocation3] }
   0xc   :  { %1796 = dma.done.wait [#allocation3], 32 }
   0xd   :  { %1797 = vsyncadd [#allocation3], 4294967264 }
   0xe   :  { %19 = sfence }
   0xf   :  { %20 = vsyncpa [#allocation6], 0 }
  0x10   :  { %21 = vsyncpa [#allocation9], 0 }
  0x11   :  { %22 = vsyncpa [#allocation7], 0  ;;  %s1805_s14 = smov [#allocation8]   ;;  %s1806_s16 = smov [#allocation5]  }
  0x12   :  { %s45_s15 = sshll.u32 %s1805_s14, 4  ;;  %s30_s0 = sshll.u32 %s1806_s16, 4  ;;  %s46_s15 = int_to_ptr.vmem [resolvable:$true] %s45_s15  ;;  %s1869_s0 = int_to_ptr.vmem [resolvable:$true] %s30_s0 }
  0x13   :  { %s1708_s19 = scalar_lea.hbm %s2089_s4, 16 }
  0x14   :  { %p1709_p5 = scmp.ne.s32.totalorder %s2089_s4, %s1708_s19  ;;  %p1712_p6 = scmp.lt.u32.totalorder %s1708_s19, %s2089_s4 }
  0x16   :  { %p1714_p7 = pnand %p1712_p6, %p1709_p5 }
  0x18   :  { %1717 = shalt.err (!%p1714_p7)
}
  0x19   :  { %s1718_s24 = scalar_lea.vmem %s46_s15, 16  ;;  %s1722_s25 = scalar_lea.vmem %s46_s15, 32 }
  0x1a   :  { %p1719_p8 = scmp.ne.s32.totalorder %s46_s15, %s1718_s24  ;;  %p1723_p9 = scmp.lt.s32.totalorder %s46_s15, %s46_s15 }
  0x1b   :  { %p1724_p10 = scmp.lt.s32.totalorder %s1722_s25, %s1718_s24 }
  0x1d   :  { %p1725_p11 = por %p1724_p10, %p1723_p9 }
  0x1f   :  { %p1726_p12 = pnand %p1725_p11, %p1719_p8 }
  0x21   :  { %1729 = shalt.err (!%p1726_p12)
}
  0x22   :  { %48 = dma.hbm_to_vmem [thread:$0]  %s2089_s4, 16, %s46_s15, [#allocation9]  }
  0x23   :  { %s1730_s30 = scalar_lea.hbm %s2087_s2, 256 }
  0x24   :  { %p1731_p13 = scmp.ne.s32.totalorder %s2087_s2, %s1730_s30  ;;  %p1734_p0 = scmp.lt.u32.totalorder %s1730_s30, %s2087_s2 }
  0x26   :  { %p1736_p1 = pnand %p1734_p0, %p1731_p13 }
  0x28   :  { %1739 = shalt.err (!%p1736_p1)
}
  0x29   :  { %s1740_s14 = scalar_lea.vmem %s1869_s0, 256  ;;  %p1745_p3 = scmp.lt.s32.totalorder %s1869_s0, %s1869_s0 }
  0x2a   :  { %p1741_p2 = scmp.ne.s32.totalorder %s1869_s0, %s1740_s14  ;;  %p1746_p4 = scmp.lt.s32.totalorder %s1740_s14, %s1740_s14 }
  0x2c   :  { %p1747_p5 = por %p1746_p4, %p1745_p3 }
  0x2e   :  { %p1748_p6 = pnand %p1747_p5, %p1741_p2 }
  0x30   :  { %1751 = shalt.err (!%p1748_p6)
}
  0x31   :  { %s1807_s4 = smov 128   ;;  %s1808_s15 = smov 8  }
  0x32   :  { %36 = dma.hbm_to_vmem [thread:$0]  %s2087_s2, 256, %s1869_s0, [#allocation6], %s1807_s4, %s1807_s4, %s1808_s15  }
  0x33   :  { %s1809_s18 = smov [#allocation10]   ;;  %s1752_s22 = scalar_lea.hbm %s2092_s7, 2048 }
  0x34   :  { %s58_s19 = sshll.u32 %s1809_s18, 4  ;;  %p1753_p7 = scmp.ne.s32.totalorder %s2092_s7, %s1752_s22  ;;  %s59_s19 = int_to_ptr.vmem [resolvable:$true] %s58_s19 }
  0x35   :  { %p1756_p8 = scmp.lt.u32.totalorder %s1752_s22, %s2092_s7 }
  0x37   :  { %p1758_p9 = pnand %p1756_p8, %p1753_p7 }
  0x39   :  { %1761 = shalt.err (!%p1758_p9)
}
  0x3a   :  { %s1762_s27 = scalar_lea.vmem %s59_s19, 2048  ;;  %p1767_p11 = scmp.lt.s32.totalorder %s59_s19, %s59_s19 }
  0x3b   :  { %p1763_p10 = scmp.ne.s32.totalorder %s59_s19, %s1762_s27  ;;  %p1768_p12 = scmp.lt.s32.totalorder %s1762_s27, %s1762_s27 }
  0x3d   :  { %p1769_p13 = por %p1768_p12, %p1767_p11 }
  0x3f   :  { %p1770_p0 = pnand %p1769_p13, %p1763_p10 }
  0x41   :  { %1773 = shalt.err (!%p1770_p0)
}
  0x42   :  { %64 = dma.hbm_to_vmem [thread:$0]  %s2092_s7, 2048, %s59_s19, [#allocation9], %s1807_s4, %s1807_s4, %s1808_s15  }
  0x43   :  { %1798 = dma.done.wait [#allocation6], 256  }
  0x44   :  { %1799 = vsyncadd [#allocation6], 4294967040 }
  0x45   :  { %1800 = dma.done.wait [#allocation9], 2064  }
  0x46   :  { %1801 = vsyncadd [#allocation9], 4294965232  ;;  %v1810_v0 = vmov 0.0|0.0   ;;  %vm1811_vm0 = vmmov 0   ;;  %v1812_v1 = vmov 0.0   ;;  %vm89_vm1 = vcmask 130048  }
  0x47   :  { %1560 = vmatprep.subr.bf16.mxu0 %v1810_v0  ;;  %1445 = vmatprep.mubr.msk.f32.mxu0 %vm1811_vm0, %v1812_v1  ;;  %v80_v2 = vld [vmem:[#allocation5] sm:$0xff]  ;;  %v81_v3 = vld [vmem:[#allocation5 + $0x8] sm:$0xff]  ;;  %v204_v10 = vld [vmem:[%s2088_s3 + $0x10] sm:$0xff]  ;;  %vm200_vm2 = vcmask 1040384   ;;  %s1813_s23 = smov 64   ;;  %s1814_s24 = smov 32  }
  0x48   :  { %v76_v4 = vld [vmem:[%s2086_s1] sm:$0xff]  ;;  %v1538_v5 = vpack.c.bf16 %v81_v3, %v80_v2  ;;  %v203_v7 = vld [vmem:[%s2088_s3 + $0x8] sm:$0xff]  ;;  %v205_v11 = vld [vmem:[%s2088_s3 + $0x18] sm:$0xff]  ;;  %vm206_vm3 = vcmask 261120   ;;  %s1296_s25 = sld [smem:[#allocation4 + $0x81]]  ;;  %s1300_s0 = sld [smem:[#allocation4 + $0x82]] }
  0x49   :  { %1398 = vmatprep.mubr.msk.f32.mxu1 %vm89_vm1, %v76_v4  ;;  %v202_v6 = vld [vmem:[%s2088_s3] sm:$0xff]  ;;  %v77_v9 = vld [vmem:[%s2086_s1 + $0x8] sm:$0xff]  ;;  %v78_v12 = vld [vmem:[%s2086_s1 + $0x10] sm:$0xff]  ;;  %v1943_v13 = vpack.c.bf16 %v205_v11, %v204_v10  ;;  %s191_s3 = sld [smem:[#allocation4]]  ;;  %s1295_s26 = sld [smem:[#allocation4 + $0x1]] }
  0x4a   :  { %1539 = vmatprep.subr.bf16.mxu1 %v1538_v5  ;;  %v1925_v8 = vpack.c.bf16 %v203_v7, %v202_v6  ;;  %v79_v14 = vld [vmem:[%s2086_s1 + $0x18] sm:$0xff]  ;;  %v1288_v15 = vld [vmem:[#allocation8] ss:$0 sm:$0xff]  ;;  %s1293_s1 = sld [smem:[#allocation4 + $0x80]]  ;;  %s1299_s28 = sld [smem:[#allocation4 + $0x2]] }
  0x4b   :  { %1541 = vmatpush3.bf16.msra.mxu1 %v1538_v5  ;;  %s1304_s30 = sld [smem:[#allocation4 + $0x83]]  ;;  %s1308_s13 = sld [smem:[#allocation4 + $0x84]] }
  0x4c   :  { %1542 = vmatprep.subr.bf16.mxu1 %v1810_v0  ;;  %1562 = vmatpush3.bf16.msra.mxu0 %v1925_v8  ;;  %s1303_s10 = sld [smem:[#allocation4 + $0x3]]  ;;  %s1307_s14 = sld [smem:[#allocation4 + $0x4]] }
  0x4d   :  { %1563 = vmatprep.subr.bf16.mxu0 %v1810_v0  ;;  %s1312_s16 = sld [smem:[#allocation4 + $0x85]]  ;;  %s1316_s20 = sld [smem:[#allocation4 + $0x86]] }
  0x4e   :  { %1399 = vmatmul.mubr.msk.f32.vlgmr.msra.gmra.mrb[0].mxu1 %vm89_vm1, %v77_v9  ;;  %s309_s27 = scalar_lea.vmem [#allocation2], %s1296_s25  ;;  %s419_s29 = scalar_lea.vmem [#allocation2], %s1300_s0 }
  0x4f   :  { %1401 = vmatprep.mubr.msk.f32.mxu1 %vm89_vm1, %v78_v12  ;;  %1544 = vmatpush3.bf16.msra.mxu1 %v1925_v8  ;;  %s192_s22 = scalar_lea.vmem [#allocation2], %s191_s3  ;;  %s306_s2 = scalar_lea.vmem [#allocation2], %s1295_s26 }
  0x50   :  { %1545 = vmatprep.subr.bf16.mxu1 %v1810_v0  ;;  %1565 = vmatpush3.bf16.msra.mxu0 %v1943_v13  ;;  %s195_s21 = scalar_lea.vmem [#allocation2], %s1293_s1  ;;  %s416_s7 = scalar_lea.vmem [#allocation2], %s1299_s28 }
  0x51   :  { %1572 = vmatprep.subr.bf16.mxu0 %v1810_v0  ;;  %s529_s11 = scalar_lea.vmem [#allocation2], %s1304_s30  ;;  %s639_s4 = scalar_lea.vmem [#allocation2], %s1308_s13 }
  0x52   :  { %1402 = vmatmul.mubr.msk.f32.gmra.mrb[2].mxu1 %vm89_vm1, %v79_v14  ;;  %s526_s12 = scalar_lea.vmem [#allocation2], %s1303_s10  ;;  %s636_s15 = scalar_lea.vmem [#allocation2], %s1307_s14 }
  0x53   :  { %1547 = vmatpush3.bf16.msra.mxu1 %v1943_v13  ;;  %1412 = vmatprep.mubr.msk.f32.mxu1 %vm1811_vm0, %v1812_v1  ;;  %s1311_s17 = sld [smem:[#allocation4 + $0x5]]  ;;  %s749_s18 = scalar_lea.vmem [#allocation2], %s1312_s16 }
  0x54   :  { %1548 = vmatprep.subr.bf16.mxu1 %v1810_v0  ;;  %s1315_s1 = sld [smem:[#allocation4 + $0x6]]  ;;  %s859_s3 = scalar_lea.vmem [#allocation2], %s1316_s20 }
  0x55   :  { %s1319_s25 = sld [smem:[#allocation4 + $0x7]]  ;;  %s1815_s13 = smov [#allocation11]  }
  0x56   :  { %1413 = vmatmul.mubr.f32.vlgmr.msra.gmra.mrb[4].mxu1 %v1812_v1  ;;  %s1262_s14 = sshll.u32 %s1815_s13, 4  ;;  %s1263_s14 = int_to_ptr.vmem [resolvable:$true] %s1262_s14 }
  0x57   :  { %1550 = vmatpush3.bf16.msra.mxu1 %v1925_v8  ;;  %1423 = vmatprep.mubr.msk.f32.mxu1 %vm1811_vm0, %v1812_v1  ;;  %p1779_p2 = scmp.lt.s32.totalorder %s1263_s14, %s1263_s14 }
  0x58   :  { %1551 = vmatprep.subr.bf16.mxu1 %v1810_v0 }
  0x59   :  { %s746_s19 = scalar_lea.vmem [#allocation2], %s1311_s17 }
  0x5b   :  { %1553 = vmatpush3.bf16.msra.mxu1 %v1943_v13 }
  0x5c   :  { %1554 = vmatprep.subr.bf16.mxu1 %v1810_v0 }
 0x121   :  { %v1400_v16 = vpop.f32.mrb[0].mxu1 }
 0x122   :  { %v174_v17 = vadd.f32 %v1400_v16, %v1288_v15  ;;  %v168_v18 = vpop.f32.mrb[1].mxu1 }
 0x123   :  { %v169_v19 = vadd.f32 %v1288_v15, %v168_v18 }
 0x124   :  { %188 = vst [vmem:[#allocation2 + $0x8] sm:$0xff] %v174_v17 }
 0x125   :  { %187 = vst [vmem:[#allocation2] sm:$0xff] %v169_v19  ;;  %v1403_v20 = vpop.f32.mrb[2].mxu1 }
 0x126   :  { %v184_v21 = vadd.f32 %v1403_v20, %v1288_v15  ;;  %v178_v22 = vpop.f32.mrb[3].mxu1 }
 0x127   :  { %v179_v23 = vadd.f32 %v1288_v15, %v178_v22 }
 0x128   :  { %190 = vst [vmem:[#allocation2 + $0x18] sm:$0xff] %v184_v21 }
 0x129   :  { %189 = vst [vmem:[#allocation2 + $0x10] sm:$0xff] %v179_v23  ;;  %v276_v24 = vpop.f32.mrb[4].mxu1 }
 0x12a   :  { %v1414_v25 = vpop.f32.mrb[5].mxu1 }
 0x130   :  { %v196_v26 = vld [vmem:[%s195_s21] sm:$0x1]  ;;  %s856_s21 = scalar_lea.vmem [#allocation2], %s1315_s1 }
 0x131   :  { %v198_v27 = vrot.slane %v196_v26, 7  ;;  %v193_v28 = vld [vmem:[%s192_s22] sm:$0x1]  ;;  %s1320_s22 = sld [smem:[#allocation4 + $0x87]] }
 0x132   :  { %v310_v45 = vld [vmem:[%s309_s27] sm:$0x1]  ;;  %s966_s27 = scalar_lea.vmem [#allocation2], %s1319_s25 }
 0x133   :  { %v201_v29 = vsel %vm200_vm2, %v193_v28, %v198_v27  ;;  %v312_v46 = vrot.slane %v310_v45, 7  ;;  %v307_v47 = vld [vmem:[%s306_s2] sm:$0x1] }
 0x134   :  { %v280_v30 = vadd.f32 %v276_v24, %v201_v29  ;;  %v420_v4 = vld [vmem:[%s419_s29] sm:$0x1] }
 0x135   :  { %v314_v48 = vsel %vm200_vm2, %v307_v47, %v312_v46  ;;  %v422_v5 = vrot.slane %v420_v4, 7  ;;  %v417_v6 = vld [vmem:[%s416_s7] sm:$0x1] }
 0x136   :  { %1632 = vtanh.f32 %v280_v30  ;;  %v1294_v32 = vmul.f32 -1.442695, %v280_v30  ;;  %v530_v27 = vld [vmem:[%s529_s11] sm:$0x1] }
 0x137   :  { %v424_v7 = vsel %vm200_vm2, %v417_v6, %v422_v5  ;;  %v532_v28 = vrot.slane %v530_v27, 7  ;;  %v527_v29 = vld [vmem:[%s526_s12] sm:$0x1]  ;;  %s969_s26 = scalar_lea.vmem [#allocation2], %s1320_s22 }
 0x138   :  { %1634 = vpow2.f32 %v1294_v32 }
 0x139   :  { %v534_v30 = vsel %vm200_vm2, %v527_v29, %v532_v28  ;;  %v860_v28 = vld [vmem:[%s859_s3] sm:$0x1] }
 0x13a   :  { %v862_v29 = vrot.slane %v860_v28, 7  ;;  %v1173_v28 = vld [vmem:[#allocation10 + $0x58] sm:$0xff] }
 0x140   :  { %v1633_v31 = vpop.eup %1632 }
 0x141   :  { %290 = vrot.lane.b32.xlu0 %v1633_v31, %s1813_s23 }
 0x142   :  { %v1635_v33 = vpop.eup %1634 }
 0x143   :  { %v284_v34 = vadd.f32 1.0, %v1635_v33 }
 0x145   :  { %1636 = vrcp.f32 %v284_v34 }
 0x14f   :  { %v1637_v35 = vpop.eup %1636 }
 0x150   :  { %v288_v38 = vmul.f32 0.0, %v1637_v35 }
 0x1b3   :  { %v291_v36 = vpop.permute.xlu0 %290 }
 0x1b4   :  { %v293_v37 = vmul.f32 %v1637_v35, %v291_v36 }
 0x1b6   :  { %295 = vrot.lane.b32.xlu0 %v293_v37, %s1814_s24 }
 0x228   :  { %v296_v39 = vpop.permute.xlu0 %295 }
 0x229   :  { %v298_v40 = vadd.f32 %v296_v39, %v288_v38 }
 0x22b   :  { %1638 = vtanh.f32 %v298_v40 }
 0x235   :  { %v1639_v41 = vpop.eup %1638 }
 0x236   :  { %301 = vrot.lane.b32.xlu1 %v1639_v41, %s1813_s23 }
 0x2a8   :  { %v302_v42 = vpop.permute.xlu1 %301 }
 0x2a9   :  { %v304_v43 = vmul.f32 %v1637_v35, %v302_v42 }
 0x2ab   :  { %316 = vrot.lane.b32.xlu1 %v304_v43, %s1814_s24 }
 0x31d   :  { %v317_v44 = vpop.permute.xlu1 %316 }
 0x31e   :  { %1424 = vmatmul.mubr.msk.f32.vlgmr.msra.gmra.mrb[6].mxu1 %vm206_vm3, %v317_v44 }
 0x31f   :  { %1556 = vmatpush3.bf16.msra.mxu1 %v1925_v8  ;;  %1434 = vmatprep.mubr.msk.f32.mxu1 %vm1811_vm0, %v1812_v1 }
 0x320   :  { %1557 = vmatprep.subr.bf16.mxu1 %v1810_v0 }
 0x323   :  { %1559 = vmatpush3.bf16.msra.mxu1 %v1943_v13 }
 0x324   :  { %1566 = vmatprep.subr.bf16.mxu1 %v1810_v0 }
 0x3f1   :  { %v386_v49 = vpop.f32.mrb[6].mxu1 }
 0x3f2   :  { %v390_v50 = vadd.f32 %v386_v49, %v314_v48  ;;  %v1425_v51 = vpop.f32.mrb[7].mxu1  ;;  %v640_v48 = vld [vmem:[%s639_s4] sm:$0x1]  ;;  %s1774_s4 = scalar_lea.vmem %s1263_s14, 32 }
 0x3f3   :  { %v642_v49 = vrot.slane %v640_v48, 7  ;;  %p1775_p1 = scmp.ne.s32.totalorder %s1263_s14, %s1774_s4  ;;  %p1780_p3 = scmp.lt.s32.totalorder %s1774_s4, %s1774_s4 }
 0x3f4   :  { %1640 = vtanh.f32 %v390_v50  ;;  %v1298_v53 = vmul.f32 -1.442695, %v390_v50  ;;  %v637_v50 = vld [vmem:[%s636_s15] sm:$0x1] }
 0x3f5   :  { %v644_v51 = vsel %vm200_vm2, %v637_v50, %v642_v49  ;;  %v970_v49 = vld [vmem:[%s969_s26] sm:$0x1]  ;;  %p1781_p4 = por %p1780_p3, %p1779_p2 }
 0x3f6   :  { %1642 = vpow2.f32 %v1298_v53  ;;  %v972_v50 = vrot.slane %v970_v49, 7 }
 0x3f7   :  { %p1782_p5 = pnand %p1781_p4, %p1775_p1 }
 0x3fe   :  { %v1641_v52 = vpop.eup %1640 }
 0x3ff   :  { %400 = vrot.lane.b32.xlu0 %v1641_v52, %s1813_s23 }
 0x400   :  { %v1643_v54 = vpop.eup %1642 }
 0x401   :  { %v394_v55 = vadd.f32 1.0, %v1643_v54 }
 0x403   :  { %1644 = vrcp.f32 %v394_v55 }
 0x40d   :  { %v1645_v56 = vpop.eup %1644 }
 0x40e   :  { %v398_v59 = vmul.f32 %v1645_v56, %v298_v40 }
 0x471   :  { %v401_v57 = vpop.permute.xlu0 %400 }
 0x472   :  { %v403_v58 = vmul.f32 %v1645_v56, %v401_v57 }
 0x474   :  { %405 = vrot.lane.b32.xlu1 %v403_v58, %s1814_s24 }
 0x4e6   :  { %v406_v60 = vpop.permute.xlu1 %405 }
 0x4e7   :  { %v408_v61 = vadd.f32 %v406_v60, %v398_v59 }
 0x4e9   :  { %1646 = vtanh.f32 %v408_v61 }
 0x4f3   :  { %v1647_v62 = vpop.eup %1646 }
 0x4f4   :  { %411 = vrot.lane.b32.xlu0 %v1647_v62, %s1813_s23 }
 0x566   :  { %v412_v63 = vpop.permute.xlu0 %411 }
 0x567   :  { %v414_v2 = vmul.f32 %v1645_v56, %v412_v63 }
 0x569   :  { %426 = vrot.lane.b32.xlu1 %v414_v2, %s1814_s24 }
 0x5db   :  { %v427_v3 = vpop.permute.xlu1 %426 }
 0x5dc   :  { %1435 = vmatmul.mubr.msk.f32.vlgmr.msra.gmra.mrb[8].mxu1 %vm206_vm3, %v427_v3 }
 0x5dd   :  { %1568 = vmatpush3.bf16.msra.mxu1 %v1925_v8  ;;  %1456 = vmatprep.mubr.msk.f32.mxu1 %vm1811_vm0, %v1812_v1 }
 0x5de   :  { %1569 = vmatprep.subr.bf16.mxu1 %v1810_v0 }
 0x5e1   :  { %1571 = vmatpush3.bf16.msra.mxu1 %v1943_v13 }
 0x5e2   :  { %1578 = vmatprep.subr.bf16.mxu1 %v1810_v0 }
 0x6af   :  { %v496_v9 = vpop.f32.mrb[8].mxu1 }
 0x6b0   :  { %v500_v10 = vadd.f32 %v496_v9, %v424_v7  ;;  %v1436_v11 = vpop.f32.mrb[9].mxu1  ;;  %v750_v7 = vld [vmem:[%s749_s18] sm:$0x1] }
 0x6b1   :  { %v752_v9 = vrot.slane %v750_v7, 7  ;;  %v1078_v7 = vld [vmem:[%s2090_s5 + $0x18] sm:$0xff] }
 0x6b2   :  { %1648 = vtanh.f32 %v500_v10  ;;  %v1302_v14 = vmul.f32 -1.442695, %v500_v10  ;;  %v747_v10 = vld [vmem:[%s746_s19] sm:$0x1] }
 0x6b3   :  { %v754_v11 = vsel %vm200_vm2, %v747_v10, %v752_v9 }
 0x6b4   :  { %1650 = vpow2.f32 %v1302_v14 }
 0x6bc   :  { %v1649_v12 = vpop.eup %1648 }
 0x6bd   :  { %510 = vrot.lane.b32.xlu0 %v1649_v12, %s1813_s23 }
 0x6be   :  { %v1651_v15 = vpop.eup %1650 }
 0x6bf   :  { %v504_v16 = vadd.f32 1.0, %v1651_v15 }
 0x6c1   :  { %1652 = vrcp.f32 %v504_v16 }
 0x6cb   :  { %v1653_v17 = vpop.eup %1652 }
 0x6cc   :  { %v508_v20 = vmul.f32 %v1653_v17, %v408_v61 }
 0x72f   :  { %v511_v18 = vpop.permute.xlu0 %510 }
 0x730   :  { %v513_v19 = vmul.f32 %v1653_v17, %v511_v18 }
 0x732   :  { %515 = vrot.lane.b32.xlu1 %v513_v19, %s1814_s24 }
 0x7a4   :  { %v516_v21 = vpop.permute.xlu1 %515 }
 0x7a5   :  { %v518_v22 = vadd.f32 %v516_v21, %v508_v20 }
 0x7a7   :  { %1654 = vtanh.f32 %v518_v22 }
 0x7b1   :  { %v1655_v23 = vpop.eup %1654 }
 0x7b2   :  { %521 = vrot.lane.b32.xlu0 %v1655_v23, %s1813_s23 }
 0x824   :  { %v522_v24 = vpop.permute.xlu0 %521 }
 0x825   :  { %v524_v25 = vmul.f32 %v1653_v17, %v522_v24 }
 0x827   :  { %536 = vrot.lane.b32.xlu1 %v524_v25, %s1814_s24 }
 0x899   :  { %v537_v26 = vpop.permute.xlu1 %536 }
 0x89a   :  { %1446 = vmatmul.mubr.msk.f32.vlgmr.msra.gmra.mrb[0].mxu0 %vm206_vm3, %v537_v26 }
 0x89b   :  { %1574 = vmatpush3.bf16.msra.mxu0 %v1925_v8  ;;  %1467 = vmatprep.mubr.msk.f32.mxu0 %vm1811_vm0, %v1812_v1 }
 0x89c   :  { %1575 = vmatprep.subr.bf16.mxu0 %v1810_v0 }
 0x89f   :  { %1577 = vmatpush3.bf16.msra.mxu0 %v1943_v13 }
 0x8a0   :  { %1584 = vmatprep.subr.bf16.mxu0 %v1810_v0 }
 0x96d   :  { %v606_v31 = vpop.f32.mrb[0].mxu0 }
 0x96e   :  { %v610_v32 = vadd.f32 %v606_v31, %v534_v30  ;;  %v1447_v33 = vpop.f32.mrb[1].mxu0  ;;  %v857_v30 = vld [vmem:[%s856_s21] sm:$0x1] }
 0x96f   :  { %v864_v31 = vsel %vm200_vm2, %v857_v30, %v862_v29  ;;  %v1174_v30 = vld [vmem:[#allocation10 + $0x60] sm:$0xff] }
 0x970   :  { %1656 = vtanh.f32 %v610_v32  ;;  %v1306_v35 = vmul.f32 -1.442695, %v610_v32 }
 0x972   :  { %1658 = vpow2.f32 %v1306_v35 }
 0x97a   :  { %v1657_v34 = vpop.eup %1656 }
 0x97b   :  { %620 = vrot.lane.b32.xlu0 %v1657_v34, %s1813_s23 }
 0x97c   :  { %v1659_v36 = vpop.eup %1658 }
 0x97d   :  { %v614_v37 = vadd.f32 1.0, %v1659_v36 }
 0x97f   :  { %1660 = vrcp.f32 %v614_v37 }
 0x989   :  { %v1661_v38 = vpop.eup %1660 }
 0x98a   :  { %v618_v41 = vmul.f32 %v1661_v38, %v518_v22 }
 0x9ed   :  { %v621_v39 = vpop.permute.xlu0 %620 }
 0x9ee   :  { %v623_v40 = vmul.f32 %v1661_v38, %v621_v39 }
 0x9f0   :  { %625 = vrot.lane.b32.xlu1 %v623_v40, %s1814_s24 }
 0xa62   :  { %v626_v42 = vpop.permute.xlu1 %625 }
 0xa63   :  { %v628_v43 = vadd.f32 %v626_v42, %v618_v41 }
 0xa65   :  { %1662 = vtanh.f32 %v628_v43 }
 0xa6f   :  { %v1663_v44 = vpop.eup %1662 }
 0xa70   :  { %631 = vrot.lane.b32.xlu0 %v1663_v44, %s1813_s23 }
 0xae2   :  { %v632_v45 = vpop.permute.xlu0 %631 }
 0xae3   :  { %v634_v46 = vmul.f32 %v1661_v38, %v632_v45 }
 0xae5   :  { %646 = vrot.lane.b32.xlu1 %v634_v46, %s1814_s24 }
 0xb57   :  { %v647_v47 = vpop.permute.xlu1 %646 }
 0xb58   :  { %1457 = vmatmul.mubr.msk.f32.vlgmr.msra.gmra.mrb[10].mxu1 %vm206_vm3, %v647_v47 }
 0xb59   :  { %1580 = vmatpush3.bf16.msra.mxu1 %v1925_v8  ;;  %1478 = vmatprep.mubr.msk.f32.mxu1 %vm1811_vm0, %v1812_v1 }
 0xb5a   :  { %1581 = vmatprep.subr.bf16.mxu1 %v1810_v0 }
 0xb5d   :  { %1583 = vmatpush3.bf16.msra.mxu1 %v1943_v13 }
 0xb5e   :  { %1590 = vmatprep.subr.bf16.mxu1 %v1810_v0 }
 0xc2b   :  { %v716_v52 = vpop.f32.mrb[10].mxu1 }
 0xc2c   :  { %v720_v53 = vadd.f32 %v716_v52, %v644_v51  ;;  %v1458_v54 = vpop.f32.mrb[11].mxu1  ;;  %v967_v51 = vld [vmem:[%s966_s27] sm:$0x1] }
 0xc2d   :  { %v974_v52 = vsel %vm200_vm2, %v967_v51, %v972_v50 }
 0xc2e   :  { %1664 = vtanh.f32 %v720_v53  ;;  %v1310_v56 = vmul.f32 -1.442695, %v720_v53 }
 0xc30   :  { %1666 = vpow2.f32 %v1310_v56 }
 0xc38   :  { %v1665_v55 = vpop.eup %1664 }
 0xc39   :  { %730 = vrot.lane.b32.xlu0 %v1665_v55, %s1813_s23 }
 0xc3a   :  { %v1667_v57 = vpop.eup %1666 }
 0xc3b   :  { %v724_v58 = vadd.f32 1.0, %v1667_v57 }
 0xc3d   :  { %1668 = vrcp.f32 %v724_v58 }
 0xc47   :  { %v1669_v59 = vpop.eup %1668 }
 0xc48   :  { %v728_v62 = vmul.f32 %v1669_v59, %v628_v43 }
 0xcab   :  { %v731_v60 = vpop.permute.xlu0 %730 }
 0xcac   :  { %v733_v61 = vmul.f32 %v1669_v59, %v731_v60 }
 0xcae   :  { %735 = vrot.lane.b32.xlu1 %v733_v61, %s1814_s24 }
 0xd20   :  { %v736_v63 = vpop.permute.xlu1 %735 }
 0xd21   :  { %v738_v2 = vadd.f32 %v736_v63, %v728_v62 }
 0xd23   :  { %1670 = vtanh.f32 %v738_v2 }
 0xd2d   :  { %v1671_v3 = vpop.eup %1670 }
 0xd2e   :  { %741 = vrot.lane.b32.xlu0 %v1671_v3, %s1813_s23  ;;  %v1075_v3 = vld [vmem:[%s2090_s5] sm:$0xff] }
 0xda0   :  { %v742_v4 = vpop.permute.xlu0 %741 }
 0xda1   :  { %v744_v5 = vmul.f32 %v1669_v59, %v742_v4  ;;  %v1076_v4 = vld [vmem:[%s2090_s5 + $0x8] sm:$0xff] }
 0xda3   :  { %756 = vrot.lane.b32.xlu1 %v744_v5, %s1814_s24  ;;  %v1077_v5 = vld [vmem:[%s2090_s5 + $0x10] sm:$0xff] }
 0xda4   :  { %v1594_v9 = vpack.c.bf16 %v1078_v7, %v1077_v5 }
 0xe15   :  { %v757_v6 = vpop.permute.xlu1 %756 }
 0xe16   :  { %1468 = vmatmul.mubr.msk.f32.vlgmr.msra.gmra.mrb[2].mxu0 %vm206_vm3, %v757_v6  ;;  %v1591_v6 = vpack.c.bf16 %v1076_v4, %v1075_v3 }
 0xe17   :  { %1586 = vmatpush3.bf16.msra.mxu0 %v1925_v8  ;;  %1489 = vmatprep.mubr.msk.f32.mxu0 %vm1811_vm0, %v1812_v1 }
 0xe18   :  { %1587 = vmatprep.subr.bf16.mxu0 %v1810_v0 }
 0xe1b   :  { %1589 = vmatpush3.bf16.msra.mxu0 %v1943_v13 }
 0xe1c   :  { %1596 = vmatprep.subr.bf16.mxu0 %v1810_v0 }
 0xee9   :  { %v826_v12 = vpop.f32.mrb[2].mxu0 }
 0xeea   :  { %v830_v8 = vadd.f32 %v826_v12, %v754_v11  ;;  %v1469_v14 = vpop.f32.mrb[3].mxu0  ;;  %v1162_v11 = vld [vmem:[#allocation10] sm:$0xff]  ;;  %v1163_v12 = vld [vmem:[#allocation10 + $0x8] sm:$0xff] }
 0xeeb   :  { %v1597_v14 = vpack.c.bf16 %v1163_v12, %v1162_v11 }
 0xeec   :  { %1672 = vtanh.f32 %v830_v8  ;;  %v1314_v16 = vmul.f32 -1.442695, %v830_v8  ;;  %v1164_v8 = vld [vmem:[#allocation10 + $0x10] sm:$0xff] }
 0xeee   :  { %1674 = vpow2.f32 %v1314_v16 }
 0xef6   :  { %v1673_v15 = vpop.eup %1672 }
 0xef7   :  { %840 = vrot.lane.b32.xlu0 %v1673_v15, %s1813_s23  ;;  %v1165_v15 = vld [vmem:[#allocation10 + $0x18] sm:$0xff] }
 0xef8   :  { %v1675_v13 = vpop.eup %1674  ;;  %v1600_v16 = vpack.c.bf16 %v1165_v15, %v1164_v8 }
 0xef9   :  { %v834_v17 = vadd.f32 1.0, %v1675_v13  ;;  %v1166_v13 = vld [vmem:[#allocation10 + $0x20] sm:$0xff] }
 0xefb   :  { %1676 = vrcp.f32 %v834_v17  ;;  %v1167_v17 = vld [vmem:[#allocation10 + $0x28] sm:$0xff] }
 0xf05   :  { %v1677_v18 = vpop.eup %1676 }
 0xf06   :  { %v838_v21 = vmul.f32 %v1677_v18, %v738_v2 }
 0xf69   :  { %v841_v19 = vpop.permute.xlu0 %840 }
 0xf6a   :  { %v843_v20 = vmul.f32 %v1677_v18, %v841_v19  ;;  %v1168_v19 = vld [vmem:[#allocation10 + $0x30] sm:$0xff] }
 0xf6c   :  { %845 = vrot.lane.b32.xlu1 %v843_v20, %s1814_s24  ;;  %v1169_v20 = vld [vmem:[#allocation10 + $0x38] sm:$0xff] }
 0xfde   :  { %v846_v22 = vpop.permute.xlu1 %845 }
 0xfdf   :  { %v848_v23 = vadd.f32 %v846_v22, %v838_v21 }
 0xfe1   :  { %1678 = vtanh.f32 %v848_v23 }
 0xfeb   :  { %v1679_v24 = vpop.eup %1678 }
 0xfec   :  { %851 = vrot.lane.b32.xlu0 %v1679_v24, %s1813_s23  ;;  %v1170_v24 = vld [vmem:[#allocation10 + $0x40] sm:$0xff] }
0x105e   :  { %v852_v25 = vpop.permute.xlu0 %851 }
0x105f   :  { %v854_v26 = vmul.f32 %v1677_v18, %v852_v25  ;;  %v1603_v18 = vpack.c.bf16 %v1167_v17, %v1166_v13  ;;  %v1171_v25 = vld [vmem:[#allocation10 + $0x48] sm:$0xff] }
0x1061   :  { %866 = vrot.lane.b32.xlu1 %v854_v26, %s1814_s24  ;;  %v1609_v26 = vpack.c.bf16 %v1171_v25, %v1170_v24 }
0x10d3   :  { %v867_v27 = vpop.permute.xlu1 %866 }
0x10d4   :  { %1479 = vmatmul.mubr.msk.f32.vlgmr.msra.gmra.mrb[12].mxu1 %vm206_vm3, %v867_v27  ;;  %v1172_v27 = vld [vmem:[#allocation10 + $0x50] sm:$0xff] }
0x10d5   :  { %1500 = vmatprep.mubr.msk.f32.mxu1 %vm1811_vm0, %v1812_v1  ;;  %1592 = vmatpush3.bf16.msra.mxu1 %v1591_v6  ;;  %v1612_v29 = vpack.c.bf16 %v1173_v28, %v1172_v27 }
0x10d6   :  { %1593 = vmatprep.subr.bf16.mxu1 %v1810_v0 }
0x10d9   :  { %1595 = vmatpush3.bf16.msra.mxu1 %v1594_v9 }
0x11a7   :  { %v936_v32 = vpop.f32.mrb[12].mxu1 }
0x11a8   :  { %v940_v33 = vadd.f32 %v936_v32, %v864_v31  ;;  %v1480_v34 = vpop.f32.mrb[13].mxu1  ;;  %v1175_v31 = vld [vmem:[#allocation10 + $0x68] sm:$0xff] }
0x11a9   :  { %v1615_v32 = vpack.c.bf16 %v1175_v31, %v1174_v30  ;;  %v1176_v34 = vld [vmem:[#allocation10 + $0x70] sm:$0xff] }
0x11aa   :  { %1680 = vtanh.f32 %v940_v33  ;;  %v1318_v36 = vmul.f32 -1.442695, %v940_v33 }
0x11ac   :  { %1682 = vpow2.f32 %v1318_v36 }
0x11b4   :  { %v1681_v35 = vpop.eup %1680 }
0x11b5   :  { %950 = vrot.lane.b32.xlu0 %v1681_v35, %s1813_s23  ;;  %v1177_v35 = vld [vmem:[#allocation10 + $0x78] sm:$0xff] }
0x11b6   :  { %v1683_v37 = vpop.eup %1682  ;;  %v1618_v36 = vpack.c.bf16 %v1177_v35, %v1176_v34 }
0x11b7   :  { %v944_v38 = vadd.f32 1.0, %v1683_v37  ;;  %v1323_v37 = vld [vmem:[%s2091_s6] ss:$0 sm:$0xff] }
0x11b9   :  { %1684 = vrcp.f32 %v944_v38 }
0x11c3   :  { %v1685_v39 = vpop.eup %1684 }
0x11c4   :  { %v948_v42 = vmul.f32 %v1685_v39, %v848_v23  ;;  %v1606_v23 = vpack.c.bf16 %v1169_v20, %v1168_v19 }
0x1227   :  { %v951_v40 = vpop.permute.xlu0 %950 }
0x1228   :  { %v953_v41 = vmul.f32 %v1685_v39, %v951_v40 }
0x122a   :  { %955 = vrot.lane.b32.xlu1 %v953_v41, %s1814_s24 }
0x129c   :  { %v956_v43 = vpop.permute.xlu1 %955 }
0x129d   :  { %v958_v44 = vadd.f32 %v956_v43, %v948_v42 }
0x129f   :  { %1686 = vtanh.f32 %v958_v44 }
0x12a9   :  { %v1687_v45 = vpop.eup %1686 }
0x12aa   :  { %961 = vrot.lane.b32.xlu0 %v1687_v45, %s1813_s23 }
0x131c   :  { %v962_v46 = vpop.permute.xlu0 %961 }
0x131d   :  { %v964_v47 = vmul.f32 %v1685_v39, %v962_v46 }
0x131f   :  { %976 = vrot.lane.b32.xlu1 %v964_v47, %s1814_s24 }
0x1391   :  { %v977_v48 = vpop.permute.xlu1 %976 }
0x1392   :  { %1490 = vmatmul.mubr.msk.f32.vlgmr.msra.gmra.mrb[4].mxu0 %vm206_vm3, %v977_v48 }
0x1393   :  { %1535 = vmatprep.mubr.msk.f32.mxu0 %vm1811_vm0, %v1812_v1  ;;  %1598 = vmatpush3.bf16.msra.mxu0 %v1597_v14 }
0x1394   :  { %1599 = vmatprep.subr.bf16.mxu0 %v1810_v0 }
0x1397   :  { %1601 = vmatpush3.bf16.msra.mxu0 %v1600_v16 }
0x1398   :  { %1602 = vmatprep.subr.bf16.mxu0 %v1810_v0 }
0x139b   :  { %1604 = vmatpush3.bf16.msra.mxu0 %v1603_v18 }
0x139c   :  { %1605 = vmatprep.subr.bf16.mxu0 %v1810_v0 }
0x139f   :  { %1607 = vmatpush3.bf16.msra.mxu0 %v1606_v23 }
0x13a0   :  { %1608 = vmatprep.subr.bf16.mxu0 %v1810_v0 }
0x13a3   :  { %1610 = vmatpush3.bf16.msra.mxu0 %v1609_v26 }
0x13a4   :  { %1611 = vmatprep.subr.bf16.mxu0 %v1810_v0 }
0x13a7   :  { %1613 = vmatpush3.bf16.msra.mxu0 %v1612_v29 }
0x13a8   :  { %1614 = vmatprep.subr.bf16.mxu0 %v1810_v0 }
0x13ab   :  { %1616 = vmatpush3.bf16.msra.mxu0 %v1615_v32 }
0x13ac   :  { %1617 = vmatprep.subr.bf16.mxu0 %v1810_v0  ;;  %v1325_v0 = vld [vmem:[%s2093_s8] ss:$0 sm:$0xff] }
0x13af   :  { %1619 = vmatpush3.bf16.msra.mxu0 %v1618_v36 }
0x1465   :  { %v1046_v53 = vpop.f32.mrb[4].mxu0 }
0x1466   :  { %v1050_v54 = vadd.f32 %v1046_v53, %v974_v52  ;;  %v1491_v55 = vpop.f32.mrb[5].mxu0 }
0x1468   :  { %1688 = vtanh.f32 %v1050_v54  ;;  %v1322_v57 = vmul.f32 -1.442695, %v1050_v54 }
0x146a   :  { %1690 = vpow2.f32 %v1322_v57 }
0x1472   :  { %v1689_v56 = vpop.eup %1688 }
0x1473   :  { %1060 = vrot.lane.b32.xlu0 %v1689_v56, %s1813_s23 }
0x1474   :  { %v1691_v58 = vpop.eup %1690 }
0x1475   :  { %v1054_v1 = vadd.f32 1.0, %v1691_v58 }
0x1477   :  { %1692 = vrcp.f32 %v1054_v1 }
0x1481   :  { %v1693_v59 = vpop.eup %1692 }
0x1482   :  { %v1058_v62 = vmul.f32 %v1693_v59, %v958_v44 }
0x14e5   :  { %v1061_v60 = vpop.permute.xlu0 %1060 }
0x14e6   :  { %v1063_v61 = vmul.f32 %v1693_v59, %v1061_v60 }
0x14e8   :  { %1065 = vrot.lane.b32.xlu1 %v1063_v61, %s1814_s24 }
0x155a   :  { %v1066_v63 = vpop.permute.xlu1 %1065 }
0x155b   :  { %v1068_v2 = vadd.f32 %v1066_v63, %v1058_v62 }
0x155d   :  { %1694 = vtanh.f32 %v1068_v2 }
0x1567   :  { %v1695_v10 = vpop.eup %1694 }
0x1568   :  { %1071 = vrot.lane.b32.xlu0 %v1695_v10, %s1813_s23 }
0x15da   :  { %v1072_v21 = vpop.permute.xlu0 %1071 }
0x15db   :  { %v1074_v22 = vmul.f32 %v1693_v59, %v1072_v21 }
0x15dd   :  { %1087 = vrot.lane.b32.xlu1 %v1074_v22, %s1814_s24 }
0x164f   :  { %v1088_v33 = vpop.permute.xlu1 %1087 }
0x1650   :  { %1501 = vmatmul.mubr.msk.f32.vlgmr.msra.gmra.mrb[14].mxu1 %vm206_vm3, %v1088_v33 }
0x1723   :  { %v1157_v38 = vpop.f32.mrb[14].mxu1 }
0x1724   :  { %v1158_v39 = vadd.f32 %v1323_v37, %v1157_v38  ;;  %v1502_v40 = vpop.f32.mrb[15].mxu1 }
0x1726   :  { %v1161_v41 = vmax.f32 %v1158_v39, 0.0 }
0x1728   :  { %1536 = vmatmul.mubr.f32.vlgmr.msra.gmra.mrb[6].mxu0 %v1161_v41 }
0x17fb   :  { %v1251_v42 = vpop.f32.mrb[6].mxu0 }
0x17fc   :  { %v1252_v43 = vadd.f32 %v1325_v0, %v1251_v42  ;;  %v1537_v44 = vpop.f32.mrb[7].mxu0 }
0x17fe   :  { %1255 = vst [vmem:[#allocation11] sm:$0x3] %v1252_v43 }
0x17ff   :  { %1785 = shalt.err (!%p1782_p5)
}
0x1800   :  { %s1786_s16 = scalar_lea.hbm %s2094_s9, 32 }
0x1801   :  { %p1787_p6 = scmp.ne.s32.totalorder %s2094_s9, %s1786_s16  ;;  %p1790_p7 = scmp.lt.u32.totalorder %s1786_s16, %s2094_s9 }
0x1803   :  { %p1792_p8 = pnand %p1790_p7, %p1787_p6 }
0x1805   :  { %1795 = shalt.err (!%p1792_p8)
}
0x1806   :  { %1265 = dma.vmem_to_hbm [thread:$0]  %s1263_s14, 32, %s2094_s9, [#allocation7]  }
0x1807   :  { %1802 = dma.done.wait [#allocation7], 32  }
0x1808   :  { %1803 = vsyncadd [#allocation7], 4294967264 }
0x1809   :  { %1269 = vsyncpa [#allocation6], 1 }
0x180a   :  { %1270 = vsyncpa [#allocation9], 1 }
0x180b   :  { %1271 = vsyncpa [#allocation7], 1 }

</bundles_post_ra>
